<compile_context>
chip_gen: v7x
topology: tpu7x:2x2x1
jax: 0.10.0
libtpu: 0.0.40
codegen_flags: <defaults>
</compile_context>

<pallas_src>
import functools

import jax
import jax.numpy as jnp
from jax.experimental import pallas as pl
from jax.experimental.pallas import tpu as pltpu

# ---- module hyper-parameters (small, consistent with the module) ------------
D_MODEL = 32
NHEAD = 8
HEAD_DIM = D_MODEL // NHEAD
TGT_LEN = 8
BSZ = 2
MEM_H = MEM_W = 4
SRC_LEN = MEM_H * MEM_W
LN_EPS = 1e-5


# ============================== fused Pallas kernel ===========================

def _mha_all_heads(q_b, k_b, v_b, hmask_rows, pm_b, *, H, Lq, Lk, E):
    """All heads of one batch element using 2-D matmuls only.

    q_b:(Lq,E) pre-scaled, k_b:(Lk,E), v_b:(Lk,E).
    hmask_rows:(H*Lq,E) head-column selector (row h*Lq+i keeps only head h's
    HEAD_DIM lanes).  pm_b:(Lq,Lk) post-softmax multiplicative mask or None.
    Returns (out:(Lq,E), weights:(H*Lq,Lk))."""
    # expand queries so row (h,i) only carries head h's columns
    q_exp = jnp.broadcast_to(q_b[None], (H, Lq, E)).reshape(H * Lq, E) * hmask_rows
    # per-head scores via one contraction over E  -> (H*Lq, Lk)
    s = jax.lax.dot_general(q_exp, k_b, (((1,), (1,)), ((), ())),
                            preferred_element_type=jnp.float32)
    m = jnp.max(s, axis=-1, keepdims=True)
    e = jnp.exp(s - m)
    p = e * pl.reciprocal(jnp.sum(e, axis=-1, keepdims=True), approx=True)
    if pm_b is not None:   # MultiHeadAttentionMy: mask multiplies AFTER softmax
        p = p * jnp.broadcast_to(pm_b[None], (H, Lq, Lk)).reshape(H * Lq, Lk)
    o = jnp.dot(p, v_b, preferred_element_type=jnp.float32)   # (H*Lq, E)
    o = o * hmask_rows                                         # keep own head's cols
    o = jnp.sum(o.reshape(H, Lq, E), axis=0)                   # (Lq, E): heads concat
    return o, p


def _out_layer_kernel(tgt_ref, qpos_ref, mem_ref, pos_ref, pm_ref, hmask_ref,
                      wqk_s_ref, bqk_s_ref, wv_s_ref, bv_s_ref, wo_s_ref, bo_s_ref,
                      g1_ref, beta1_ref, wq_c_ref, bq_c_ref, wk_c_ref, bk_c_ref,
                      out_ref, w_ref, *, B, H, Lq, Lk, E):
    tgt = tgt_ref[...]                    # (B*Lq, E), batch-major rows b*Lq + i
    qpos = qpos_ref[...]
    hmask = hmask_ref[...]                # (H*Lq, E)

    # ------------- 1. self attention (nn.MultiheadAttention, no masks) -------
    xq = tgt + qpos                                            # q = k = tgt + query_pos
    qk = jnp.dot(xq, wqk_s_ref[...], preferred_element_type=jnp.float32) + bqk_s_ref[...]
    q_s = qk[:, :E]                       # 1/sqrt(head_dim) already folded into W/b
    k_s = qk[:, E:]
    v_s = jnp.dot(tgt, wv_s_ref[...], preferred_element_type=jnp.float32) + bv_s_ref[...]

    sa = []
    for b in range(B):                    # B is tiny & static -> unrolled
        o_b, _ = _mha_all_heads(q_s[b * Lq:(b + 1) * Lq], k_s[b * Lq:(b + 1) * Lq],
                                v_s[b * Lq:(b + 1) * Lq], hmask, None,
                                H=H, Lq=Lq, Lk=Lq, E=E)
        sa.append(o_b)
    sa = jnp.concatenate(sa, axis=0)                           # (B*Lq, E)
    sa = jnp.dot(sa, wo_s_ref[...], preferred_element_type=jnp.float32) + bo_s_ref[...]

    # ------------- 2. residual + LayerNorm (norm1), dropout1 = identity ------
    x = tgt + sa
    mu = jnp.mean(x, axis=-1, keepdims=True)
    xc = x - mu
    var = jnp.mean(xc * xc, axis=-1, keepdims=True)
    x = xc * jax.lax.rsqrt(var + LN_EPS) * g1_ref[...] + beta1_ref[...]

    # ------------- 3. cross attention (MultiHeadAttentionMy, outDecoderLayer) -
    mem = mem_ref[...]                                         # (B*Lk, E)
    q_c = jnp.dot(x + qpos, wq_c_ref[...],
                  preferred_element_type=jnp.float32) + bq_c_ref[...]
    k_c = jnp.dot(mem + pos_ref[...], wk_c_ref[...],
                  preferred_element_type=jnp.float32) + bk_c_ref[...]

    ca = []
    for b in range(B):
        o_b, p_b = _mha_all_heads(q_c[b * Lq:(b + 1) * Lq], k_c[b * Lk:(b + 1) * Lk],
                                  mem[b * Lk:(b + 1) * Lk], hmask, pm_ref[b],
                                  H=H, Lq=Lq, Lk=Lk, E=E)
        # post-softmax masked weights, layout (B, nhead, Lq, Lk)
        w_ref[b] = p_b.reshape(H, Lq, Lk).astype(w_ref.dtype)
        ca.append(o_b)
    tgt2 = jnp.concatenate(ca, axis=0)                         # (B*Lq, E), no out-proj

    # ------------- 4. L2 normalize over d_model ------------------------------
    nrm = jnp.sqrt(jnp.sum(tgt2 * tgt2, axis=-1, keepdims=True))       # (B*Lq, 1)
    any_zero = jnp.max((nrm == 0.0).astype(jnp.float32), axis=0, keepdims=True)
    denom = nrm + any_zero * 1e-10          # +1e-10 only if ANY row norm == 0
    out_ref[...] = (tgt2 / denom).astype(out_ref.dtype)


# ================================ wrapper =====================================

def _full_spec(shape):
    n = len(shape)
    return pl.BlockSpec(shape, lambda i, _n=n: (0,) * _n)


def transformer_decoder_out_layer(params, tgt, memory, query_pos, pos, proposal_mask):
    """TransformerDecoderOutLayerLinear.forward (eval, need_weights=False)."""
    Lq, B, E = tgt.shape
    Lk = memory.shape[0]
    H = NHEAD
    Dh = E // H
    scaling = float(Dh) ** -0.5
    dt = tgt.dtype

    # batch-major, lane-dim = E (plain XLA input-layout plumbing, done once)
    tgt_bf = tgt.transpose(1, 0, 2).reshape(B * Lq, E)
    qpos_bf = query_pos.transpose(1, 0, 2).reshape(B * Lq, E)
    mem_bf = memory.transpose(1, 0, 2).reshape(B * Lk, E)
    pos_bf = pos.transpose(1, 0, 2).reshape(B * Lk, E)
    pm = proposal_mask.reshape(B, Lq, Lk).astype(dt)   # == proposal_mask.view(b, q, -1)

    # head-selection rows: row h*Lq+i keeps only head h's Dh columns of E
    hmask = (jnp.arange(E)[None, :] // Dh == jnp.arange(H)[:, None]).astype(dt)
    hmask = jnp.repeat(hmask, Lq, axis=0)                        # (H*Lq, E)

    # self-attn Q/K fused into one (E, 2E) matmul; scaling folded into Wq, bq
    wqk_s = jnp.concatenate([params["sa_wq"] * scaling, params["sa_wk"]], axis=1)
    bqk_s = jnp.concatenate([params["sa_bq"] * scaling, params["sa_bk"]]).reshape(1, 2 * E)
    wq_c = params["ca_wq"] * scaling
    bq_c = (params["ca_bq"] * scaling).reshape(1, E)

    inputs = (
        tgt_bf, qpos_bf, mem_bf, pos_bf, pm, hmask,
        wqk_s, bqk_s, params["sa_wv"], params["sa_bv"].reshape(1, E),
        params["sa_wo"], params["sa_bo"].reshape(1, E),
        params["norm1_g"].reshape(1, E), params["norm1_b"].reshape(1, E),
        wq_c, bq_c, params["ca_wk"], params["ca_bk"].reshape(1, E),
    )

    kernel = functools.partial(_out_layer_kernel, B=B, H=H, Lq=Lq, Lk=Lk, E=E)
    # Single block: everything fits in one VMEM tile at these shapes; the
    # (norm == 0).any() check is a global reduction, so we keep one invocation.
    out2d, attn_w = pl.pallas_call(
        kernel,
        out_shape=(jax.ShapeDtypeStruct((B * Lq, E), dt),
                   jax.ShapeDtypeStruct((B, H, Lq, Lk), dt)),
        grid=(1,),
        in_specs=[_full_spec(a.shape) for a in inputs],
        out_specs=(_full_spec((B * Lq, E)), _full_spec((B, H, Lq, Lk))),
        compiler_params=pltpu.CompilerParams(dimension_semantics=("arbitrary",)),
    )(*inputs)

    out = out2d.reshape(B, Lq, E).transpose(1, 0, 2)             # back to (Lq, B, E)
    return out, attn_w


# ============================ deterministic params ============================

def init_params(key, scale=0.05):
    ks = jax.random.split(key, 6)
    z = jnp.zeros((D_MODEL,), jnp.float32)
    return {
        # self_attn (nn.MultiheadAttention); weights stored (in, out): y = x @ w + b
        "sa_wq": scale * jax.random.normal(ks[0], (D_MODEL, D_MODEL), jnp.float32),
        "sa_wk": scale * jax.random.normal(ks[1], (D_MODEL, D_MODEL), jnp.float32),
        "sa_wv": scale * jax.random.normal(ks[2], (D_MODEL, D_MODEL), jnp.float32),
        "sa_wo": scale * jax.random.normal(ks[3], (D_MODEL, D_MODEL), jnp.float32),
        "sa_bq": z, "sa_bk": z, "sa_bv": z, "sa_bo": z,   # biases init to 0 (as in module)
        # multihead_attn_my (outDecoderLayer=True): only Q/K projections are used
        "ca_wq": scale * jax.random.normal(ks[4], (D_MODEL, D_MODEL), jnp.float32),
        "ca_wk": scale * jax.random.normal(ks[5], (D_MODEL, D_MODEL), jnp.float32),
        "ca_bq": z, "ca_bk": z,
        # norm1
        "norm1_g": jnp.ones((D_MODEL,), jnp.float32),
        "norm1_b": z,
    }


# ==================================== main ====================================

if __name__ == "__main__":
    root = jax.random.PRNGKey(0)
    kp, kt, km, kqp, kpos, kmask = jax.random.split(root, 6)

    params = init_params(kp)
    tgt = jax.random.normal(kt, (TGT_LEN, BSZ, D_MODEL), jnp.float32)       # queries
    memory = jax.random.normal(km, (SRC_LEN, BSZ, D_MODEL), jnp.float32)    # flattened features
    query_pos = jax.random.normal(kqp, (TGT_LEN, BSZ, D_MODEL), jnp.float32)
    pos = jax.random.normal(kpos, (SRC_LEN, BSZ, D_MODEL), jnp.float32)
    proposal_mask = (jax.random.uniform(kmask, (BSZ, TGT_LEN, MEM_H, MEM_W)) > 0.5
                     ).astype(jnp.float32)

    fwd = jax.jit(transformer_decoder_out_layer)
    out, attn_w = fwd(params, tgt, memory, query_pos, pos, proposal_mask)
    jax.block_until_ready((out, attn_w))

    assert out.shape == (TGT_LEN, BSZ, D_MODEL)
    assert attn_w.shape == (BSZ, NHEAD, TGT_LEN, SRC_LEN)
    print("KERNEL_OK")
</pallas_src>

<mosaic_0001>
module attributes {stable_mosaic.version = 11 : i64} {
  func.func @_out_layer_kernel(%arg0: i32, %arg1: memref<16x32xf32, #tpu.memory_space<vmem>>, %arg2: memref<16x32xf32, #tpu.memory_space<vmem>>, %arg3: memref<32x32xf32, #tpu.memory_space<vmem>>, %arg4: memref<32x32xf32, #tpu.memory_space<vmem>>, %arg5: memref<2x8x16xf32, #tpu.memory_space<vmem>>, %arg6: memref<64x32xf32, #tpu.memory_space<vmem>>, %arg7: memref<32x64xf32, #tpu.memory_space<vmem>>, %arg8: memref<1x64xf32, #tpu.memory_space<vmem>>, %arg9: memref<32x32xf32, #tpu.memory_space<vmem>>, %arg10: memref<1x32xf32, #tpu.memory_space<vmem>>, %arg11: memref<32x32xf32, #tpu.memory_space<vmem>>, %arg12: memref<1x32xf32, #tpu.memory_space<vmem>>, %arg13: memref<1x32xf32, #tpu.memory_space<vmem>>, %arg14: memref<1x32xf32, #tpu.memory_space<vmem>>, %arg15: memref<32x32xf32, #tpu.memory_space<vmem>>, %arg16: memref<1x32xf32, #tpu.memory_space<vmem>>, %arg17: memref<32x32xf32, #tpu.memory_space<vmem>>, %arg18: memref<1x32xf32, #tpu.memory_space<vmem>>, %arg19: memref<16x32xf32, #tpu.memory_space<vmem>>, %arg20: memref<2x8x8x16xf32, #tpu.memory_space<vmem>>) attributes {dimension_semantics = [#tpu.dimension_semantics<arbitrary>], iteration_bounds = array<i64: 1>, scalar_prefetch = 0 : i64, scratch_operands = 0 : i64, tpu.core_type = #tpu.core_type<tc>, window_params = [{pipeline_mode = #tpu.pipeline_mode<synchronous>, transform_indices = @transform_0, window_bounds = array<i64: 16, 32>}, {pipeline_mode = #tpu.pipeline_mode<synchronous>, transform_indices = @transform_1, window_bounds = array<i64: 16, 32>}, {pipeline_mode = #tpu.pipeline_mode<synchronous>, transform_indices = @transform_2, window_bounds = array<i64: 32, 32>}, {pipeline_mode = #tpu.pipeline_mode<synchronous>, transform_indices = @transform_3, window_bounds = array<i64: 32, 32>}, {pipeline_mode = #tpu.pipeline_mode<synchronous>, transform_indices = @transform_4, window_bounds = array<i64: 2, 8, 16>}, {pipeline_mode = #tpu.pipeline_mode<synchronous>, transform_indices = @transform_5, window_bounds = array<i64: 64, 32>}, {pipeline_mode = #tpu.pipeline_mode<synchronous>, transform_indices = @transform_6, window_bounds = array<i64: 32, 64>}, {pipeline_mode = #tpu.pipeline_mode<synchronous>, transform_indices = @transform_7, window_bounds = array<i64: 1, 64>}, {pipeline_mode = #tpu.pipeline_mode<synchronous>, transform_indices = @transform_8, window_bounds = array<i64: 32, 32>}, {pipeline_mode = #tpu.pipeline_mode<synchronous>, transform_indices = @transform_9, window_bounds = array<i64: 1, 32>}, {pipeline_mode = #tpu.pipeline_mode<synchronous>, transform_indices = @transform_10, window_bounds = array<i64: 32, 32>}, {pipeline_mode = #tpu.pipeline_mode<synchronous>, transform_indices = @transform_11, window_bounds = array<i64: 1, 32>}, {pipeline_mode = #tpu.pipeline_mode<synchronous>, transform_indices = @transform_12, window_bounds = array<i64: 1, 32>}, {pipeline_mode = #tpu.pipeline_mode<synchronous>, transform_indices = @transform_13, window_bounds = array<i64: 1, 32>}, {pipeline_mode = #tpu.pipeline_mode<synchronous>, transform_indices = @transform_14, window_bounds = array<i64: 32, 32>}, {pipeline_mode = #tpu.pipeline_mode<synchronous>, transform_indices = @transform_15, window_bounds = array<i64: 1, 32>}, {pipeline_mode = #tpu.pipeline_mode<synchronous>, transform_indices = @transform_16, window_bounds = array<i64: 32, 32>}, {pipeline_mode = #tpu.pipeline_mode<synchronous>, transform_indices = @transform_17, window_bounds = array<i64: 1, 32>}, {pipeline_mode = #tpu.pipeline_mode<synchronous>, transform_indices = @transform_18, window_bounds = array<i64: 16, 32>}, {pipeline_mode = #tpu.pipeline_mode<synchronous>, transform_indices = @transform_19, window_bounds = array<i64: 2, 8, 8, 16>}]} {
    %c0 = arith.constant 0 : index
    %c0_0 = arith.constant 0 : index
    %0 = vector.load %arg1[%c0, %c0_0] : memref<16x32xf32, #tpu.memory_space<vmem>>, vector<16x32xf32>
    %c0_1 = arith.constant 0 : index
    %c0_2 = arith.constant 0 : index
    %1 = vector.load %arg2[%c0_1, %c0_2] : memref<16x32xf32, #tpu.memory_space<vmem>>, vector<16x32xf32>
    %c0_3 = arith.constant 0 : index
    %c0_4 = arith.constant 0 : index
    %2 = vector.load %arg6[%c0_3, %c0_4] : memref<64x32xf32, #tpu.memory_space<vmem>>, vector<64x32xf32>
    %3 = arith.addf %0, %1 : vector<16x32xf32>
    %c0_5 = arith.constant 0 : index
    %c0_6 = arith.constant 0 : index
    %4 = vector.load %arg7[%c0_5, %c0_6] : memref<32x64xf32, #tpu.memory_space<vmem>>, vector<32x64xf32>
    %cst = arith.constant dense<0.000000e+00> : vector<16x64xf32>
    %5 = tpu.matmul %3, %4, %cst {dimension_numbers = #tpu.dot_dimension_numbers<[1], [0], [0], [1], [0, 0, 1, 1], [], []>} : vector<16x32xf32>, vector<32x64xf32>, vector<16x64xf32> -> vector<16x64xf32>
    %c0_7 = arith.constant 0 : index
    %c0_8 = arith.constant 0 : index
    %6 = vector.load %arg8[%c0_7, %c0_8] : memref<1x64xf32, #tpu.memory_space<vmem>>, vector<1x64xf32>
    %7 = vector.broadcast %6 : vector<1x64xf32> to vector<16x64xf32>
    %8 = arith.addf %5, %7 : vector<16x64xf32>
    %9 = vector.extract_strided_slice %8 {offsets = [0, 0], sizes = [16, 32], strides = [1, 1]} : vector<16x64xf32> to vector<16x32xf32>
    %10 = vector.extract_strided_slice %8 {offsets = [0, 32], sizes = [16, 32], strides = [1, 1]} : vector<16x64xf32> to vector<16x32xf32>
    %c0_9 = arith.constant 0 : index
    %c0_10 = arith.constant 0 : index
    %11 = vector.load %arg9[%c0_9, %c0_10] : memref<32x32xf32, #tpu.memory_space<vmem>>, vector<32x32xf32>
    %cst_11 = arith.constant dense<0.000000e+00> : vector<16x32xf32>
    %12 = tpu.matmul %0, %11, %cst_11 {dimension_numbers = #tpu.dot_dimension_numbers<[1], [0], [0], [1], [0, 0, 1, 1], [], []>} : vector<16x32xf32>, vector<32x32xf32>, vector<16x32xf32> -> vector<16x32xf32>
    %c0_12 = arith.constant 0 : index
    %c0_13 = arith.constant 0 : index
    %13 = vector.load %arg10[%c0_12, %c0_13] : memref<1x32xf32, #tpu.memory_space<vmem>>, vector<1x32xf32>
    %14 = vector.broadcast %13 : vector<1x32xf32> to vector<16x32xf32>
    %15 = arith.addf %12, %14 : vector<16x32xf32>
    %16 = vector.extract_strided_slice %9 {offsets = [0, 0], sizes = [8, 32], strides = [1, 1]} : vector<16x32xf32> to vector<8x32xf32>
    %17 = vector.extract_strided_slice %10 {offsets = [0, 0], sizes = [8, 32], strides = [1, 1]} : vector<16x32xf32> to vector<8x32xf32>
    %18 = vector.extract_strided_slice %15 {offsets = [0, 0], sizes = [8, 32], strides = [1, 1]} : vector<16x32xf32> to vector<8x32xf32>
    %19 = vector.shape_cast %16 : vector<8x32xf32> to vector<1x8x32xf32>
    %20 = vector.shape_cast %19 : vector<1x8x32xf32> to vector<1x8x32xf32>
    %21 = vector.broadcast %20 : vector<1x8x32xf32> to vector<8x8x32xf32>
    %22 = vector.shape_cast %21 : vector<8x8x32xf32> to vector<64x32xf32>
    %23 = arith.mulf %22, %2 : vector<64x32xf32>
    %cst_14 = arith.constant dense<0.000000e+00> : vector<64x8xf32>
    %24 = tpu.matmul %23, %17, %cst_14 {dimension_numbers = #tpu.dot_dimension_numbers<[1], [1], [0], [0], [0, 0, 1, 0], [], []>} : vector<64x32xf32>, vector<8x32xf32>, vector<64x8xf32> -> vector<64x8xf32>
    %cst_15 = arith.constant dense<0xFF800000> : vector<64xf32>
    %25 = vector.multi_reduction <maximumf>, %24, %cst_15 [1] : vector<64x8xf32> to vector<64xf32>
    %26 = vector.shape_cast %25 : vector<64xf32> to vector<64x1xf32>
    %27 = vector.broadcast %26 : vector<64x1xf32> to vector<64x8xf32>
    %28 = arith.subf %24, %27 : vector<64x8xf32>
    %29 = math.exp %28 : vector<64x8xf32>
    %cst_16 = arith.constant dense<0.000000e+00> : vector<64xf32>
    %30 = vector.multi_reduction <add>, %29, %cst_16 [1] : vector<64x8xf32> to vector<64xf32>
    %31 = vector.shape_cast %30 : vector<64xf32> to vector<64x1xf32>
    %32 = tpu.reciprocal %31 {approx = true} : vector<64x1xf32> -> vector<64x1xf32>
    %33 = vector.broadcast %32 : vector<64x1xf32> to vector<64x8xf32>
    %34 = arith.mulf %29, %33 : vector<64x8xf32>
    %cst_17 = arith.constant dense<0.000000e+00> : vector<64x32xf32>
    %35 = tpu.matmul %34, %18, %cst_17 {dimension_numbers = #tpu.dot_dimension_numbers<[1], [0], [0], [1], [0, 0, 1, 1], [], []>} : vector<64x8xf32>, vector<8x32xf32>, vector<64x32xf32> -> vector<64x32xf32>
    %36 = arith.mulf %35, %2 : vector<64x32xf32>
    %37 = vector.shape_cast %36 : vector<64x32xf32> to vector<8x8x32xf32>
    %cst_18 = arith.constant dense<0.000000e+00> : vector<8x32xf32>
    %38 = vector.multi_reduction <add>, %37, %cst_18 [0] : vector<8x8x32xf32> to vector<8x32xf32>
    %39 = vector.extract_strided_slice %9 {offsets = [8, 0], sizes = [8, 32], strides = [1, 1]} : vector<16x32xf32> to vector<8x32xf32>
    %40 = vector.extract_strided_slice %10 {offsets = [8, 0], sizes = [8, 32], strides = [1, 1]} : vector<16x32xf32> to vector<8x32xf32>
    %41 = vector.extract_strided_slice %15 {offsets = [8, 0], sizes = [8, 32], strides = [1, 1]} : vector<16x32xf32> to vector<8x32xf32>
    %42 = vector.shape_cast %39 : vector<8x32xf32> to vector<1x8x32xf32>
    %43 = vector.shape_cast %42 : vector<1x8x32xf32> to vector<1x8x32xf32>
    %44 = vector.broadcast %43 : vector<1x8x32xf32> to vector<8x8x32xf32>
    %45 = vector.shape_cast %44 : vector<8x8x32xf32> to vector<64x32xf32>
    %46 = arith.mulf %45, %2 : vector<64x32xf32>
    %cst_19 = arith.constant dense<0.000000e+00> : vector<64x8xf32>
    %47 = tpu.matmul %46, %40, %cst_19 {dimension_numbers = #tpu.dot_dimension_numbers<[1], [1], [0], [0], [0, 0, 1, 0], [], []>} : vector<64x32xf32>, vector<8x32xf32>, vector<64x8xf32> -> vector<64x8xf32>
    %cst_20 = arith.constant dense<0xFF800000> : vector<64xf32>
    %48 = vector.multi_reduction <maximumf>, %47, %cst_20 [1] : vector<64x8xf32> to vector<64xf32>
    %49 = vector.shape_cast %48 : vector<64xf32> to vector<64x1xf32>
    %50 = vector.broadcast %49 : vector<64x1xf32> to vector<64x8xf32>
    %51 = arith.subf %47, %50 : vector<64x8xf32>
    %52 = math.exp %51 : vector<64x8xf32>
    %cst_21 = arith.constant dense<0.000000e+00> : vector<64xf32>
    %53 = vector.multi_reduction <add>, %52, %cst_21 [1] : vector<64x8xf32> to vector<64xf32>
    %54 = vector.shape_cast %53 : vector<64xf32> to vector<64x1xf32>
    %55 = tpu.reciprocal %54 {approx = true} : vector<64x1xf32> -> vector<64x1xf32>
    %56 = vector.broadcast %55 : vector<64x1xf32> to vector<64x8xf32>
    %57 = arith.mulf %52, %56 : vector<64x8xf32>
    %cst_22 = arith.constant dense<0.000000e+00> : vector<64x32xf32>
    %58 = tpu.matmul %57, %41, %cst_22 {dimension_numbers = #tpu.dot_dimension_numbers<[1], [0], [0], [1], [0, 0, 1, 1], [], []>} : vector<64x8xf32>, vector<8x32xf32>, vector<64x32xf32> -> vector<64x32xf32>
    %59 = arith.mulf %58, %2 : vector<64x32xf32>
    %60 = vector.shape_cast %59 : vector<64x32xf32> to vector<8x8x32xf32>
    %cst_23 = arith.constant dense<0.000000e+00> : vector<8x32xf32>
    %61 = vector.multi_reduction <add>, %60, %cst_23 [0] : vector<8x8x32xf32> to vector<8x32xf32>
    %62 = tpu.concatenate %38, %61 in 0 : vector<8x32xf32>, vector<8x32xf32> -> vector<16x32xf32>
    %c0_24 = arith.constant 0 : index
    %c0_25 = arith.constant 0 : index
    %63 = vector.load %arg11[%c0_24, %c0_25] : memref<32x32xf32, #tpu.memory_space<vmem>>, vector<32x32xf32>
    %cst_26 = arith.constant dense<0.000000e+00> : vector<16x32xf32>
    %64 = tpu.matmul %62, %63, %cst_26 {dimension_numbers = #tpu.dot_dimension_numbers<[1], [0], [0], [1], [0, 0, 1, 1], [], []>} : vector<16x32xf32>, vector<32x32xf32>, vector<16x32xf32> -> vector<16x32xf32>
    %c0_27 = arith.constant 0 : index
    %c0_28 = arith.constant 0 : index
    %65 = vector.load %arg12[%c0_27, %c0_28] : memref<1x32xf32, #tpu.memory_space<vmem>>, vector<1x32xf32>
    %66 = vector.broadcast %65 : vector<1x32xf32> to vector<16x32xf32>
    %67 = arith.addf %64, %66 : vector<16x32xf32>
    %68 = arith.addf %0, %67 : vector<16x32xf32>
    %cst_29 = arith.constant dense<0.000000e+00> : vector<16xf32>
    %69 = vector.multi_reduction <add>, %68, %cst_29 [1] : vector<16x32xf32> to vector<16xf32>
    %70 = vector.shape_cast %69 : vector<16xf32> to vector<16x1xf32>
    %cst_30 = arith.constant 3.200000e+01 : f32
    %71 = vector.broadcast %cst_30 : f32 to vector<16x1xf32>
    %72 = arith.divf %70, %71 : vector<16x1xf32>
    %73 = vector.broadcast %72 : vector<16x1xf32> to vector<16x32xf32>
    %74 = arith.subf %68, %73 : vector<16x32xf32>
    %75 = arith.mulf %74, %74 : vector<16x32xf32>
    %cst_31 = arith.constant dense<0.000000e+00> : vector<16xf32>
    %76 = vector.multi_reduction <add>, %75, %cst_31 [1] : vector<16x32xf32> to vector<16xf32>
    %77 = vector.shape_cast %76 : vector<16xf32> to vector<16x1xf32>
    %cst_32 = arith.constant 3.200000e+01 : f32
    %78 = vector.broadcast %cst_32 : f32 to vector<16x1xf32>
    %79 = arith.divf %77, %78 : vector<16x1xf32>
    %cst_33 = arith.constant 9.99999974E-6 : f32
    %80 = vector.broadcast %cst_33 : f32 to vector<16x1xf32>
    %81 = arith.addf %79, %80 : vector<16x1xf32>
    %82 = math.rsqrt %81 : vector<16x1xf32>
    %83 = vector.broadcast %82 : vector<16x1xf32> to vector<16x32xf32>
    %84 = arith.mulf %74, %83 : vector<16x32xf32>
    %c0_34 = arith.constant 0 : index
    %c0_35 = arith.constant 0 : index
    %85 = vector.load %arg13[%c0_34, %c0_35] : memref<1x32xf32, #tpu.memory_space<vmem>>, vector<1x32xf32>
    %86 = vector.broadcast %85 : vector<1x32xf32> to vector<16x32xf32>
    %87 = arith.mulf %84, %86 : vector<16x32xf32>
    %c0_36 = arith.constant 0 : index
    %c0_37 = arith.constant 0 : index
    %88 = vector.load %arg14[%c0_36, %c0_37] : memref<1x32xf32, #tpu.memory_space<vmem>>, vector<1x32xf32>
    %89 = vector.broadcast %88 : vector<1x32xf32> to vector<16x32xf32>
    %90 = arith.addf %87, %89 : vector<16x32xf32>
    %c0_38 = arith.constant 0 : index
    %c0_39 = arith.constant 0 : index
    %91 = vector.load %arg3[%c0_38, %c0_39] : memref<32x32xf32, #tpu.memory_space<vmem>>, vector<32x32xf32>
    %92 = arith.addf %90, %1 : vector<16x32xf32>
    %c0_40 = arith.constant 0 : index
    %c0_41 = arith.constant 0 : index
    %93 = vector.load %arg15[%c0_40, %c0_41] : memref<32x32xf32, #tpu.memory_space<vmem>>, vector<32x32xf32>
    %cst_42 = arith.constant dense<0.000000e+00> : vector<16x32xf32>
    %94 = tpu.matmul %92, %93, %cst_42 {dimension_numbers = #tpu.dot_dimension_numbers<[1], [0], [0], [1], [0, 0, 1, 1], [], []>} : vector<16x32xf32>, vector<32x32xf32>, vector<16x32xf32> -> vector<16x32xf32>
    %c0_43 = arith.constant 0 : index
    %c0_44 = arith.constant 0 : index
    %95 = vector.load %arg16[%c0_43, %c0_44] : memref<1x32xf32, #tpu.memory_space<vmem>>, vector<1x32xf32>
    %96 = vector.broadcast %95 : vector<1x32xf32> to vector<16x32xf32>
    %97 = arith.addf %94, %96 : vector<16x32xf32>
    %c0_45 = arith.constant 0 : index
    %c0_46 = arith.constant 0 : index
    %98 = vector.load %arg4[%c0_45, %c0_46] : memref<32x32xf32, #tpu.memory_space<vmem>>, vector<32x32xf32>
    %99 = arith.addf %91, %98 : vector<32x32xf32>
    %c0_47 = arith.constant 0 : index
    %c0_48 = arith.constant 0 : index
    %100 = vector.load %arg17[%c0_47, %c0_48] : memref<32x32xf32, #tpu.memory_space<vmem>>, vector<32x32xf32>
    %cst_49 = arith.constant dense<0.000000e+00> : vector<32x32xf32>
    %101 = tpu.matmul %99, %100, %cst_49 {dimension_numbers = #tpu.dot_dimension_numbers<[1], [0], [0], [1], [0, 0, 1, 1], [], []>} : vector<32x32xf32>, vector<32x32xf32>, vector<32x32xf32> -> vector<32x32xf32>
    %c0_50 = arith.constant 0 : index
    %c0_51 = arith.constant 0 : index
    %102 = vector.load %arg18[%c0_50, %c0_51] : memref<1x32xf32, #tpu.memory_space<vmem>>, vector<1x32xf32>
    %103 = vector.broadcast %102 : vector<1x32xf32> to vector<32x32xf32>
    %104 = arith.addf %101, %103 : vector<32x32xf32>
    %105 = vector.extract_strided_slice %97 {offsets = [0, 0], sizes = [8, 32], strides = [1, 1]} : vector<16x32xf32> to vector<8x32xf32>
    %106 = vector.extract_strided_slice %104 {offsets = [0, 0], sizes = [16, 32], strides = [1, 1]} : vector<32x32xf32> to vector<16x32xf32>
    %107 = vector.extract_strided_slice %91 {offsets = [0, 0], sizes = [16, 32], strides = [1, 1]} : vector<32x32xf32> to vector<16x32xf32>
    %c0_52 = arith.constant 0 : index
    %c0_53 = arith.constant 0 : index
    %c0_54 = arith.constant 0 : index
    %108 = vector.load %arg5[%c0_52, %c0_53, %c0_54] : memref<2x8x16xf32, #tpu.memory_space<vmem>>, vector<1x8x16xf32>
    %109 = vector.shape_cast %108 : vector<1x8x16xf32> to vector<8x16xf32>
    %110 = vector.shape_cast %105 : vector<8x32xf32> to vector<1x8x32xf32>
    %111 = vector.shape_cast %110 : vector<1x8x32xf32> to vector<1x8x32xf32>
    %112 = vector.broadcast %111 : vector<1x8x32xf32> to vector<8x8x32xf32>
    %113 = vector.shape_cast %112 : vector<8x8x32xf32> to vector<64x32xf32>
    %114 = arith.mulf %113, %2 : vector<64x32xf32>
    %cst_55 = arith.constant dense<0.000000e+00> : vector<64x16xf32>
    %115 = tpu.matmul %114, %106, %cst_55 {dimension_numbers = #tpu.dot_dimension_numbers<[1], [1], [0], [0], [0, 0, 1, 0], [], []>} : vector<64x32xf32>, vector<16x32xf32>, vector<64x16xf32> -> vector<64x16xf32>
    %cst_56 = arith.constant dense<0xFF800000> : vector<64xf32>
    %116 = vector.multi_reduction <maximumf>, %115, %cst_56 [1] : vector<64x16xf32> to vector<64xf32>
    %117 = vector.shape_cast %116 : vector<64xf32> to vector<64x1xf32>
    %118 = vector.broadcast %117 : vector<64x1xf32> to vector<64x16xf32>
    %119 = arith.subf %115, %118 : vector<64x16xf32>
    %120 = math.exp %119 : vector<64x16xf32>
    %cst_57 = arith.constant dense<0.000000e+00> : vector<64xf32>
    %121 = vector.multi_reduction <add>, %120, %cst_57 [1] : vector<64x16xf32> to vector<64xf32>
    %122 = vector.shape_cast %121 : vector<64xf32> to vector<64x1xf32>
    %123 = tpu.reciprocal %122 {approx = true} : vector<64x1xf32> -> vector<64x1xf32>
    %124 = vector.broadcast %123 : vector<64x1xf32> to vector<64x16xf32>
    %125 = arith.mulf %120, %124 : vector<64x16xf32>
    %126 = vector.shape_cast %109 : vector<8x16xf32> to vector<1x8x16xf32>
    %127 = vector.shape_cast %126 : vector<1x8x16xf32> to vector<1x8x16xf32>
    %128 = vector.broadcast %127 : vector<1x8x16xf32> to vector<8x8x16xf32>
    %129 = vector.shape_cast %128 : vector<8x8x16xf32> to vector<64x16xf32>
    %130 = arith.mulf %125, %129 : vector<64x16xf32>
    %cst_58 = arith.constant dense<0.000000e+00> : vector<64x32xf32>
    %131 = tpu.matmul %130, %107, %cst_58 {dimension_numbers = #tpu.dot_dimension_numbers<[1], [0], [0], [1], [0, 0, 1, 1], [], []>} : vector<64x16xf32>, vector<16x32xf32>, vector<64x32xf32> -> vector<64x32xf32>
    %132 = arith.mulf %131, %2 : vector<64x32xf32>
    %133 = vector.shape_cast %132 : vector<64x32xf32> to vector<8x8x32xf32>
    %cst_59 = arith.constant dense<0.000000e+00> : vector<8x32xf32>
    %134 = vector.multi_reduction <add>, %133, %cst_59 [0] : vector<8x8x32xf32> to vector<8x32xf32>
    %135 = vector.shape_cast %130 : vector<64x16xf32> to vector<8x8x16xf32>
    %c0_60 = arith.constant 0 : index
    %c0_61 = arith.constant 0 : index
    %c0_62 = arith.constant 0 : index
    %c0_63 = arith.constant 0 : index
    %136 = vector.load %arg20[%c0_60, %c0_61, %c0_62, %c0_63] : memref<2x8x8x16xf32, #tpu.memory_space<vmem>>, vector<1x8x8x16xf32>
    %137 = vector.shape_cast %136 : vector<1x8x8x16xf32> to vector<8x8x16xf32>
    %138 = vector.shape_cast %135 : vector<8x8x16xf32> to vector<1x8x8x16xf32>
    tpu.vector_store %arg20[%c0_60, %c0_61, %c0_62, %c0_63], %138 {strides = array<i32>} : memref<2x8x8x16xf32, #tpu.memory_space<vmem>>, vector<1x8x8x16xf32>,
    %139 = vector.extract_strided_slice %97 {offsets = [8, 0], sizes = [8, 32], strides = [1, 1]} : vector<16x32xf32> to vector<8x32xf32>
    %140 = vector.extract_strided_slice %104 {offsets = [16, 0], sizes = [16, 32], strides = [1, 1]} : vector<32x32xf32> to vector<16x32xf32>
    %141 = vector.extract_strided_slice %91 {offsets = [16, 0], sizes = [16, 32], strides = [1, 1]} : vector<32x32xf32> to vector<16x32xf32>
    %c1 = arith.constant 1 : index
    %c0_64 = arith.constant 0 : index
    %c0_65 = arith.constant 0 : index
    %142 = vector.load %arg5[%c1, %c0_64, %c0_65] : memref<2x8x16xf32, #tpu.memory_space<vmem>>, vector<1x8x16xf32>
    %143 = vector.shape_cast %142 : vector<1x8x16xf32> to vector<8x16xf32>
    %144 = vector.shape_cast %139 : vector<8x32xf32> to vector<1x8x32xf32>
    %145 = vector.shape_cast %144 : vector<1x8x32xf32> to vector<1x8x32xf32>
    %146 = vector.broadcast %145 : vector<1x8x32xf32> to vector<8x8x32xf32>
    %147 = vector.shape_cast %146 : vector<8x8x32xf32> to vector<64x32xf32>
    %148 = arith.mulf %147, %2 : vector<64x32xf32>
    %cst_66 = arith.constant dense<0.000000e+00> : vector<64x16xf32>
    %149 = tpu.matmul %148, %140, %cst_66 {dimension_numbers = #tpu.dot_dimension_numbers<[1], [1], [0], [0], [0, 0, 1, 0], [], []>} : vector<64x32xf32>, vector<16x32xf32>, vector<64x16xf32> -> vector<64x16xf32>
    %cst_67 = arith.constant dense<0xFF800000> : vector<64xf32>
    %150 = vector.multi_reduction <maximumf>, %149, %cst_67 [1] : vector<64x16xf32> to vector<64xf32>
    %151 = vector.shape_cast %150 : vector<64xf32> to vector<64x1xf32>
    %152 = vector.broadcast %151 : vector<64x1xf32> to vector<64x16xf32>
    %153 = arith.subf %149, %152 : vector<64x16xf32>
    %154 = math.exp %153 : vector<64x16xf32>
    %cst_68 = arith.constant dense<0.000000e+00> : vector<64xf32>
    %155 = vector.multi_reduction <add>, %154, %cst_68 [1] : vector<64x16xf32> to vector<64xf32>
    %156 = vector.shape_cast %155 : vector<64xf32> to vector<64x1xf32>
    %157 = tpu.reciprocal %156 {approx = true} : vector<64x1xf32> -> vector<64x1xf32>
    %158 = vector.broadcast %157 : vector<64x1xf32> to vector<64x16xf32>
    %159 = arith.mulf %154, %158 : vector<64x16xf32>
    %160 = vector.shape_cast %143 : vector<8x16xf32> to vector<1x8x16xf32>
    %161 = vector.shape_cast %160 : vector<1x8x16xf32> to vector<1x8x16xf32>
    %162 = vector.broadcast %161 : vector<1x8x16xf32> to vector<8x8x16xf32>
    %163 = vector.shape_cast %162 : vector<8x8x16xf32> to vector<64x16xf32>
    %164 = arith.mulf %159, %163 : vector<64x16xf32>
    %cst_69 = arith.constant dense<0.000000e+00> : vector<64x32xf32>
    %165 = tpu.matmul %164, %141, %cst_69 {dimension_numbers = #tpu.dot_dimension_numbers<[1], [0], [0], [1], [0, 0, 1, 1], [], []>} : vector<64x16xf32>, vector<16x32xf32>, vector<64x32xf32> -> vector<64x32xf32>
    %166 = arith.mulf %165, %2 : vector<64x32xf32>
    %167 = vector.shape_cast %166 : vector<64x32xf32> to vector<8x8x32xf32>
    %cst_70 = arith.constant dense<0.000000e+00> : vector<8x32xf32>
    %168 = vector.multi_reduction <add>, %167, %cst_70 [0] : vector<8x8x32xf32> to vector<8x32xf32>
    %169 = vector.shape_cast %164 : vector<64x16xf32> to vector<8x8x16xf32>
    %c1_71 = arith.constant 1 : index
    %c0_72 = arith.constant 0 : index
    %c0_73 = arith.constant 0 : index
    %c0_74 = arith.constant 0 : index
    %170 = vector.load %arg20[%c1_71, %c0_72, %c0_73, %c0_74] : memref<2x8x8x16xf32, #tpu.memory_space<vmem>>, vector<1x8x8x16xf32>
    %171 = vector.shape_cast %170 : vector<1x8x8x16xf32> to vector<8x8x16xf32>
    %172 = vector.shape_cast %169 : vector<8x8x16xf32> to vector<1x8x8x16xf32>
    tpu.vector_store %arg20[%c1_71, %c0_72, %c0_73, %c0_74], %172 {strides = array<i32>} : memref<2x8x8x16xf32, #tpu.memory_space<vmem>>, vector<1x8x8x16xf32>,
    %173 = tpu.concatenate %134, %168 in 0 : vector<8x32xf32>, vector<8x32xf32> -> vector<16x32xf32>
    %174 = arith.mulf %173, %173 : vector<16x32xf32>
    %cst_75 = arith.constant dense<0.000000e+00> : vector<16xf32>
    %175 = vector.multi_reduction <add>, %174, %cst_75 [1] : vector<16x32xf32> to vector<16xf32>
    %176 = vector.shape_cast %175 : vector<16xf32> to vector<16x1xf32>
    %177 = math.sqrt %176 : vector<16x1xf32>
    %cst_76 = arith.constant 0.000000e+00 : f32
    %178 = vector.broadcast %cst_76 : f32 to vector<16x1xf32>
    %179 = arith.cmpf oeq, %177, %178 : vector<16x1xf32>
    %180 = arith.extui %179 : vector<16x1xi1> to vector<16x1xi32>
    %181 = arith.sitofp %180 : vector<16x1xi32> to vector<16x1xf32>
    %cst_77 = arith.constant dense<0xFF800000> : vector<1xf32>
    %182 = vector.multi_reduction <maximumf>, %181, %cst_77 [0] : vector<16x1xf32> to vector<1xf32>
    %183 = vector.shape_cast %182 : vector<1xf32> to vector<1x1xf32>
    %cst_78 = arith.constant 1.000000e-10 : f32
    %184 = vector.broadcast %cst_78 : f32 to vector<1x1xf32>
    %185 = arith.mulf %183, %184 : vector<1x1xf32>
    %186 = vector.broadcast %185 : vector<1x1xf32> to vector<16x1xf32>
    %187 = arith.addf %177, %186 : vector<16x1xf32>
    %188 = vector.broadcast %187 : vector<16x1xf32> to vector<16x32xf32>
    %189 = arith.divf %173, %188 : vector<16x32xf32>
    %c0_79 = arith.constant 0 : index
    %c0_80 = arith.constant 0 : index
    %190 = vector.load %arg19[%c0_79, %c0_80] : memref<16x32xf32, #tpu.memory_space<vmem>>, vector<16x32xf32>
    tpu.vector_store %arg19[%c0_79, %c0_80], %189 {strides = array<i32>} : memref<16x32xf32, #tpu.memory_space<vmem>>, vector<16x32xf32>,
    return
  }
  func.func @transform_0(%arg0: i32) -> (i32, i32) {
    %c0_i32 = arith.constant 0 : i32
    %c0_i32_0 = arith.constant 0 : i32
    %c0_i32_1 = arith.constant 0 : i32
    return %c0_i32, %c0_i32_0 : i32, i32
  }
  func.func @transform_1(%arg0: i32) -> (i32, i32) {
    %c0_i32 = arith.constant 0 : i32
    %c0_i32_0 = arith.constant 0 : i32
    %c0_i32_1 = arith.constant 0 : i32
    return %c0_i32, %c0_i32_0 : i32, i32
  }
  func.func @transform_2(%arg0: i32) -> (i32, i32) {
    %c0_i32 = arith.constant 0 : i32
    %c0_i32_0 = arith.constant 0 : i32
    %c0_i32_1 = arith.constant 0 : i32
    return %c0_i32, %c0_i32_0 : i32, i32
  }
  func.func @transform_3(%arg0: i32) -> (i32, i32) {
    %c0_i32 = arith.constant 0 : i32
    %c0_i32_0 = arith.constant 0 : i32
    %c0_i32_1 = arith.constant 0 : i32
    return %c0_i32, %c0_i32_0 : i32, i32
  }
  func.func @transform_4(%arg0: i32) -> (i32, i32, i32) {
    %c0_i32 = arith.constant 0 : i32
    %c0_i32_0 = arith.constant 0 : i32
    %c0_i32_1 = arith.constant 0 : i32
    %c0_i32_2 = arith.constant 0 : i32
    return %c0_i32, %c0_i32_0, %c0_i32_1 : i32, i32, i32
  }
  func.func @transform_5(%arg0: i32) -> (i32, i32) {
    %c0_i32 = arith.constant 0 : i32
    %c0_i32_0 = arith.constant 0 : i32
    %c0_i32_1 = arith.constant 0 : i32
    return %c0_i32, %c0_i32_0 : i32, i32
  }
  func.func @transform_6(%arg0: i32) -> (i32, i32) {
    %c0_i32 = arith.constant 0 : i32
    %c0_i32_0 = arith.constant 0 : i32
    %c0_i32_1 = arith.constant 0 : i32
    return %c0_i32, %c0_i32_0 : i32, i32
  }
  func.func @transform_7(%arg0: i32) -> (i32, i32) {
    %c0_i32 = arith.constant 0 : i32
    %c0_i32_0 = arith.constant 0 : i32
    %c0_i32_1 = arith.constant 0 : i32
    return %c0_i32, %c0_i32_0 : i32, i32
  }
  func.func @transform_8(%arg0: i32) -> (i32, i32) {
    %c0_i32 = arith.constant 0 : i32
    %c0_i32_0 = arith.constant 0 : i32
    %c0_i32_1 = arith.constant 0 : i32
    return %c0_i32, %c0_i32_0 : i32, i32
  }
  func.func @transform_9(%arg0: i32) -> (i32, i32) {
    %c0_i32 = arith.constant 0 : i32
    %c0_i32_0 = arith.constant 0 : i32
    %c0_i32_1 = arith.constant 0 : i32
    return %c0_i32, %c0_i32_0 : i32, i32
  }
  func.func @transform_10(%arg0: i32) -> (i32, i32) {
    %c0_i32 = arith.constant 0 : i32
    %c0_i32_0 = arith.constant 0 : i32
    %c0_i32_1 = arith.constant 0 : i32
    return %c0_i32, %c0_i32_0 : i32, i32
  }
  func.func @transform_11(%arg0: i32) -> (i32, i32) {
    %c0_i32 = arith.constant 0 : i32
    %c0_i32_0 = arith.constant 0 : i32
    %c0_i32_1 = arith.constant 0 : i32
    return %c0_i32, %c0_i32_0 : i32, i32
  }
  func.func @transform_12(%arg0: i32) -> (i32, i32) {
    %c0_i32 = arith.constant 0 : i32
    %c0_i32_0 = arith.constant 0 : i32
    %c0_i32_1 = arith.constant 0 : i32
    return %c0_i32, %c0_i32_0 : i32, i32
  }
  func.func @transform_13(%arg0: i32) -> (i32, i32) {
    %c0_i32 = arith.constant 0 : i32
    %c0_i32_0 = arith.constant 0 : i32
    %c0_i32_1 = arith.constant 0 : i32
    return %c0_i32, %c0_i32_0 : i32, i32
  }
  func.func @transform_14(%arg0: i32) -> (i32, i32) {
    %c0_i32 = arith.constant 0 : i32
    %c0_i32_0 = arith.constant 0 : i32
    %c0_i32_1 = arith.constant 0 : i32
    return %c0_i32, %c0_i32_0 : i32, i32
  }
  func.func @transform_15(%arg0: i32) -> (i32, i32) {
    %c0_i32 = arith.constant 0 : i32
    %c0_i32_0 = arith.constant 0 : i32
    %c0_i32_1 = arith.constant 0 : i32
    return %c0_i32, %c0_i32_0 : i32, i32
  }
  func.func @transform_16(%arg0: i32) -> (i32, i32) {
    %c0_i32 = arith.constant 0 : i32
    %c0_i32_0 = arith.constant 0 : i32
    %c0_i32_1 = arith.constant 0 : i32
    return %c0_i32, %c0_i32_0 : i32, i32
  }
  func.func @transform_17(%arg0: i32) -> (i32, i32) {
    %c0_i32 = arith.constant 0 : i32
    %c0_i32_0 = arith.constant 0 : i32
    %c0_i32_1 = arith.constant 0 : i32
    return %c0_i32, %c0_i32_0 : i32, i32
  }
  func.func @transform_18(%arg0: i32) -> (i32, i32) {
    %c0_i32 = arith.constant 0 : i32
    %c0_i32_0 = arith.constant 0 : i32
    %c0_i32_1 = arith.constant 0 : i32
    return %c0_i32, %c0_i32_0 : i32, i32
  }
  func.func @transform_19(%arg0: i32) -> (i32, i32, i32, i32) {
    %c0_i32 = arith.constant 0 : i32
    %c0_i32_0 = arith.constant 0 : i32
    %c0_i32_1 = arith.constant 0 : i32
    %c0_i32_2 = arith.constant 0 : i32
    %c0_i32_3 = arith.constant 0 : i32
    return %c0_i32, %c0_i32_0, %c0_i32_1, %c0_i32_2 : i32, i32, i32, i32
  }
}

</mosaic_0001>

<bundles_post_ra>
// kernel: transformer_decoder_out_layer.1
= control target key start
LH: loop header
LB: loop body
LE: loop exit
PB: predicated region body
PF: predicated region fallthrough
CT: control target
= control target key end

     0   :  { %s3688_s0 = inlined_call_operand.vmem [shape: f32[16,32], index: 0, kind: input, shape index: {}]   ;;  %s3689_s1 = inlined_call_operand.vmem [shape: f32[16,32], index: 1, kind: input, shape index: {}]   ;;  %s3690_s2 = inlined_call_operand.vmem [shape: f32[32,32], index: 2, kind: input, shape index: {}]   ;;  %s3691_s3 = inlined_call_operand.vmem [shape: f32[32,32], index: 3, kind: input, shape index: {}]   ;;  %s3692_s4 = inlined_call_operand.vmem [shape: f32[2,8,16], index: 4, kind: input, shape index: {}]   ;;  %s3693_s5 = inlined_call_operand.vmem [shape: f32[64,32], index: 5, kind: input, shape index: {}]   ;;  %s3694_s6 = inlined_call_operand.vmem [shape: f32[32,64], index: 6, kind: input, shape index: {}]   ;;  %s3695_s7 = inlined_call_operand.vmem [shape: f32[1,64], index: 7, kind: input, shape index: {}]   ;;  %s3696_s8 = inlined_call_operand.vmem [shape: f32[32,32], index: 8, kind: input, shape index: {}]   ;;  %s3697_s9 = inlined_call_operand.vmem [shape: f32[1,32], index: 9, kind: input, shape index: {}]   ;;  %s3698_s10 = inlined_call_operand.vmem [shape: f32[32,32], index: 10, kind: input, shape index: {}]   ;;  %s3699_s11 = inlined_call_operand.vmem [shape: f32[1,32], index: 11, kind: input, shape index: {}]   ;;  %s3700_s12 = inlined_call_operand.vmem [shape: f32[1,32], index: 12, kind: input, shape index: {}]   ;;  %s3701_s13 = inlined_call_operand.vmem [shape: f32[1,32], index: 13, kind: input, shape index: {}]   ;;  %s3702_s14 = inlined_call_operand.vmem [shape: f32[32,32], index: 14, kind: input, shape index: {}]   ;;  %s3703_s15 = inlined_call_operand.vmem [shape: f32[1,32], index: 15, kind: input, shape index: {}]   ;;  %s3704_s16 = inlined_call_operand.vmem [shape: f32[32,32], index: 16, kind: input, shape index: {}]   ;;  %s3705_s17 = inlined_call_operand.vmem [shape: f32[1,32], index: 17, kind: input, shape index: {}]   ;;  %s3706_s18 = inlined_call_operand.vmem [shape: f32[16,32], index: 18, kind: output, shape index: {0}]   ;;  %s3707_s19 = inlined_call_operand.hbm [shape: f32[2,8,8,16], index: 19, kind: output, shape index: {1}]  }
   0x1   :  { %3712 = sst [smem:[#allocation5_spill]] %s3688_s0 }
   0x2   :  { %3713 = sst [smem:[#allocation6_spill]] %s3689_s1 }
   0x3   :  { %3714 = sst [smem:[#allocation7_spill]] %s3690_s2 }
   0x4   :  { %3715 = sst [smem:[#allocation8_spill]] %s3691_s3 }
   0x5   :  { %v76_v0 = vld [vmem:[%s3694_s6] sm:$0xff]  ;;  %v77_v1 = vld [vmem:[%s3694_s6 + $0x8] sm:$0xff]  ;;  %v78_v2 = vld [vmem:[%s3694_s6 + $0x10] sm:$0xff]  ;;  %s3716_s3 = sld [smem:[#allocation5_spill]]  ;;  %s3717_s28 = sld [smem:[#allocation6_spill]]  ;;  %vm87_vm0 = vcmask 261120  }
   0x6   :  { %v2624_v3 = vpack.c.bf16 %v77_v1, %v76_v0  ;;  %v79_v4 = vld [vmem:[%s3694_s6 + $0x18] sm:$0xff]  ;;  %v169_v9 = vld [vmem:[%s3696_s8] sm:$0xff]  ;;  %v170_v10 = vld [vmem:[%s3696_s8 + $0x8] sm:$0xff] }
   0x7   :  { %v2628_v7 = vpack.c.bf16 %v79_v4, %v78_v2 }
   0x8   :  { %2625 = vmatprep.subr.bf16.mxu0 %v2624_v3 }
   0xb   :  { %v2983_v5 = vld [vmem:[%s3716_s3] sm:$0xff] }
   0xc   :  { %v2988_v6 = vld [vmem:[%s3717_s28] sm:$0xff]  ;;  %2465 = vmatprep.mubr.msk.f32.mxu1 %vm87_vm0, %v2983_v5 }
   0xd   :  { %v74_v8 = vadd.f32 %v2988_v6, %v2983_v5 }
   0xe   :  { %25 = vsyncpa [#allocation3], 0  ;;  %2627 = vmatpush3.bf16.msra.mxu0 %v2624_v3  ;;  %v3004_v11 = vld [vmem:[%s3716_s3 + $0x8] sm:$0xff]  ;;  %v2632_v13 = vpack.c.bf16 %v170_v10, %v169_v9  ;;  %v171_v15 = vld [vmem:[%s3696_s8 + $0x10] sm:$0xff]  ;;  %vm403_vm1 = vcmask 64512   ;;  %s3718_s26 = sld [smem:[#allocation7_spill]] }
   0xf   :  { %2454 = vmatprep.mubr.msk.f32.mxu0 %vm87_vm0, %v74_v8  ;;  %v3009_v12 = vld [vmem:[%s3717_s28 + $0x8] sm:$0xff]  ;;  %2629 = vmatprep.subr.bf16.mxu0 %v2628_v7  ;;  %v172_v16 = vld [vmem:[%s3696_s8 + $0x18] sm:$0xff]  ;;  %v2246_v18 = vld [vmem:[%s3695_s7] ss:$0 sm:$0xff]  ;;  %s2863_s8 = smov 96   ;;  %s3719_s29 = sld [smem:[#allocation8_spill]] }
  0x10   :  { %2633 = vmatprep.subr.bf16.mxu1 %v2632_v13  ;;  %v75_v14 = vadd.f32 %v3009_v12, %v3004_v11  ;;  %v2636_v17 = vpack.c.bf16 %v172_v16, %v171_v15  ;;  %v3028_v21 = vld [vmem:[%s3693_s5] sm:$0xff]  ;;  %v3033_v22 = vld [vmem:[%s3693_s5 + $0x30] sm:$0xff]  ;;  %v3045_v32 = vld [vmem:[%s3693_s5 + $0x8] sm:$0xff]  ;;  %vm1523_vm3 = vcmask 130048  }
  0x11   :  { %2635 = vmatpush3.bf16.msra.mxu1 %v2632_v13  ;;  %v2249_v29 = vld [vmem:[%s3697_s9] ss:$0 sm:$0xff]  ;;  %v3050_v33 = vld [vmem:[%s3693_s5 + $0x38] sm:$0xff]  ;;  %v3057_v34 = vld [vmem:[%s3693_s5 + $0x10] sm:$0xff] }
  0x12   :  { %2631 = vmatpush3.bf16.msra.mxu0 %v2628_v7  ;;  %2637 = vmatprep.subr.bf16.mxu1 %v2636_v17  ;;  %v3067_v39 = vld [vmem:[%s3693_s5 + $0x18] sm:$0xff]  ;;  %v3076_v41 = vld [vmem:[%s3693_s5 + $0x20] sm:$0xff]  ;;  %v3086_v44 = vld [vmem:[%s3693_s5 + $0x28] sm:$0xff] }
  0x13   :  { %vm3404_vm2 = vmpackc.low %vm87_vm0, %vm87_vm0 }
  0x15   :  { %2455 = vmatmul.mubr.msk.f32.vlgmr.msra.gmra.mrb[0].mxu0 %vm87_vm0, %v75_v14  ;;  %2639 = vmatpush3.bf16.msra.mxu1 %v2636_v17 }
  0x18   :  { %2466 = vmatmul.mubr.msk.f32.vlgmr.msra.gmra.mrb[0].mxu1 %vm87_vm0, %v3004_v11 }
  0xe8   :  { %v2456_v19 = vpop.f32.mrb[0].mxu0 }
  0xe9   :  { %v160_v20 = vpop.f32.mrb[1].mxu0  ;;  %v166_v26 = vadd.f32 %v2456_v19, %v2246_v18 }
  0xea   :  { %v161_v23 = vadd.f32 %v2246_v18, %v160_v20 }
  0xeb   :  { %v2467_v27 = vpop.f32.mrb[0].mxu1  ;;  %v644_v46 = vmul.f32 %v166_v26, %v3028_v21  ;;  %v645_v47 = vmul.f32 %v166_v26, %v3045_v32  ;;  %v646_v48 = vmul.f32 %v166_v26, %v3057_v34  ;;  %v647_v49 = vmul.f32 %v166_v26, %v3067_v39 }
  0xec   :  { %270 = vrot.lane.b32.xlu0 %v161_v23, %s2863_s8  ;;  %v261_v24 = vmul.f32 %v161_v23, %v3028_v21  ;;  %v267_v25 = vmul.f32 %v161_v23, %v3033_v22  ;;  %v252_v28 = vpop.f32.mrb[1].mxu1  ;;  %v262_v35 = vmul.f32 %v161_v23, %v3045_v32  ;;  %v268_v36 = vmul.f32 %v161_v23, %v3050_v33 }
  0xed   :  { %v253_v30 = vadd.f32 %v2249_v29, %v252_v28  ;;  %v263_v38 = vmul.f32 %v161_v23, %v3057_v34  ;;  %v3069_v40 = vadd.f32 %v2467_v27, %v2249_v29  ;;  %v264_v42 = vmul.f32 %v161_v23, %v3067_v39 }
  0xee   :  { %2470 = vmatprep.mubr.msk.f32.mxu0 %vm87_vm0, %v261_v24  ;;  %2479 = vmatprep.mubr.msk.f32.mxu1 %vm87_vm0, %v267_v25  ;;  %v265_v43 = vmul.f32 %v161_v23, %v3076_v41  ;;  %v266_v45 = vmul.f32 %v161_v23, %v3086_v44  ;;  %v648_v50 = vmul.f32 %v166_v26, %v3076_v41 }
  0xef   :  { %v649_v51 = vmul.f32 %v166_v26, %v3086_v44  ;;  %v650_v52 = vmul.f32 %v166_v26, %v3033_v22  ;;  %v651_v53 = vmul.f32 %v166_v26, %v3050_v33 }
  0xf0   :  { %653 = vrot.lane.b32.xlu0 %v166_v26, %s2863_s8 }
 0x15e   :  { %v271_v31 = vpop.permute.xlu0 %270 }
 0x15f   :  { %2468 = vmatprep.subr.msk.mxu0 %vm87_vm0, %v271_v31  ;;  %2684 = vmatprep.subr.msk.mxu1 %vm87_vm0, %v271_v31 }
 0x160   :  { %2469 = vmatpush3.xpose.msk.msra.mxu0 %vm87_vm0, %v271_v31  ;;  %2685 = vmatpush3.xpose.msk.msra.mxu1 %vm87_vm0, %v271_v31 }
 0x161   :  { %2482 = vmatprep.subr.mxu1 %v253_v30 }
 0x162   :  { %v654_v37 = vpop.permute.xlu0 %653 }
 0x163   :  { %2471 = vmatmul.mubr.msk.f32.vlgmr.msra.gmra.mrb[2].mxu0 %vm87_vm0, %v262_v35  ;;  %2480 = vmatmul.mubr.msk.f32.vlgmr.msra.gmra.mrb[2].mxu1 %vm87_vm0, %v268_v36 }
 0x164   :  { %2496 = vmatprep.subr.msk.mxu0 %vm87_vm0, %v654_v37  ;;  %2473 = vmatprep.mubr.msk.f32.mxu0 %vm87_vm0, %v263_v38 }
 0x165   :  { %2497 = vmatpush3.xpose.msk.msra.mxu0 %vm87_vm0, %v654_v37  ;;  %2483 = vmatpush3.msra.mxu1 %v253_v30 }
 0x166   :  { %2510 = vmatprep.subr.mxu1 %v3069_v40 }
 0x167   :  { %2474 = vmatmul.mubr.msk.f32.gmra.mrb[4].mxu0 %vm87_vm0, %v264_v42 }
 0x168   :  { %2476 = vmatprep.mubr.msk.f32.mxu0 %vm87_vm0, %v265_v43 }
 0x16b   :  { %2477 = vmatmul.mubr.msk.f32.gmra.mrb[6].mxu0 %vm87_vm0, %v266_v45 }
 0x16c   :  { %2498 = vmatprep.mubr.msk.f32.mxu0 %vm87_vm0, %v644_v46 }
 0x16f   :  { %2499 = vmatmul.mubr.msk.f32.vlgmr.msra.gmra.mrb[8].mxu0 %vm87_vm0, %v645_v47 }
 0x170   :  { %2501 = vmatprep.mubr.msk.f32.mxu0 %vm87_vm0, %v646_v48 }
 0x173   :  { %2502 = vmatmul.mubr.msk.f32.gmra.mrb[10].mxu0 %vm87_vm0, %v647_v49 }
 0x174   :  { %2504 = vmatprep.mubr.msk.f32.mxu0 %vm87_vm0, %v648_v50 }
 0x177   :  { %2505 = vmatmul.mubr.msk.f32.gmra.mrb[12].mxu0 %vm87_vm0, %v649_v51 }
 0x178   :  { %2507 = vmatprep.mubr.msk.f32.mxu0 %vm87_vm0, %v650_v52 }
 0x17b   :  { %2508 = vmatmul.mubr.msk.f32.gmra.mrb[14].mxu0 %vm87_vm0, %v651_v53 }
 0x236   :  { %v2472_v54 = vpop.f32.mrb[2].mxu0  ;;  %v3109_v55 = vpop.f32.mrb[2].mxu1 }
 0x237   :  { %v364_v56 = vpop.f32.mrb[3].mxu0  ;;  %v3111_v57 = vpop.f32.mrb[3].mxu1  ;;  %v407_v58 = vsel %vm403_vm1, %v2472_v54, -inf  ;;  %v425_v9 = vsel %vm403_vm1, %v3109_v55, -inf }
 0x238   :  { %408 = vmax.xlane.f32.xlu1 %v407_v58  ;;  %v404_v61 = vsel %vm403_vm1, %v364_v56, -inf  ;;  %v422_v4 = vsel %vm403_vm1, %v3111_v57, -inf }
 0x23a   :  { %v2475_v59 = vpop.f32.mrb[4].mxu0 }
 0x23b   :  { %v374_v60 = vpop.f32.mrb[5].mxu0  ;;  %v413_v1 = vsel %vm403_vm1, %v2475_v59, -inf }
 0x23c   :  { %405 = vmax.xlane.f32.xlu1 %v404_v61  ;;  %v410_v62 = vsel %vm403_vm1, %v374_v60, -inf }
 0x23d   :  { %411 = vmax.xlane.f32.xlu0 %v410_v62 }
 0x23e   :  { %v3116_v63 = vpop.f32.mrb[6].mxu0 }
 0x23f   :  { %v3118_v0 = vpop.f32.mrb[7].mxu0  ;;  %v419_v15 = vsel %vm403_vm1, %v3116_v63, -inf }
 0x240   :  { %414 = vmax.xlane.f32.xlu1 %v413_v1  ;;  %v416_v20 = vsel %vm403_vm1, %v3118_v0, -inf }
 0x242   :  { %v3121_v2 = vpop.f32.mrb[8].mxu0 }
 0x243   :  { %v3123_v3 = vpop.f32.mrb[9].mxu0  ;;  %v789_v23 = vsel %vm403_vm1, %v3121_v2, -inf }
 0x244   :  { %423 = vmax.xlane.f32.xlu1 %v422_v4  ;;  %v786_v24 = vsel %vm403_vm1, %v3123_v3, -inf }
 0x246   :  { %v3127_v7 = vpop.f32.mrb[10].mxu0 }
 0x247   :  { %v3129_v8 = vpop.f32.mrb[11].mxu0  ;;  %v795_v10 = vsel %vm403_vm1, %v3127_v7, -inf }
 0x248   :  { %426 = vmax.xlane.f32.xlu1 %v425_v9  ;;  %796 = vmax.xlane.f32.xlu0 %v795_v10  ;;  %v792_v25 = vsel %vm403_vm1, %v3129_v8, -inf }
 0x24a   :  { %v3135_v13 = vpop.f32.mrb[12].mxu0 }
 0x24b   :  { %v3137_v14 = vpop.f32.mrb[13].mxu0  ;;  %v801_v16 = vsel %vm403_vm1, %v3135_v13, -inf }
 0x24c   :  { %420 = vmax.xlane.f32.xlu1 %v419_v15  ;;  %802 = vmax.xlane.f32.xlu0 %v801_v16  ;;  %v798_v26 = vsel %vm403_vm1, %v3137_v14, -inf }
 0x24e   :  { %v3143_v17 = vpop.f32.mrb[14].mxu0 }
 0x24f   :  { %v3145_v18 = vpop.f32.mrb[15].mxu0  ;;  %v807_v19 = vsel %vm403_vm1, %v3143_v17, -inf }
 0x250   :  { %808 = vmax.xlane.f32.xlu0 %v807_v19  ;;  %417 = vmax.xlane.f32.xlu1 %v416_v20  ;;  %v804_v27 = vsel %vm403_vm1, %v3145_v18, -inf }
 0x254   :  { %790 = vmax.xlane.f32.xlu1 %v789_v23 }
 0x258   :  { %787 = vmax.xlane.f32.xlu1 %v786_v24 }
 0x25c   :  { %793 = vmax.xlane.f32.xlu1 %v792_v25 }
 0x260   :  { %799 = vmax.xlane.f32.xlu1 %v798_v26 }
 0x264   :  { %805 = vmax.xlane.f32.xlu1 %v804_v27 }
 0x2c5   :  { %v409_v28 = vpop.xlane.xlu1 %408 }
 0x2c6   :  { %v429_v29 = vsub.f32 %v2472_v54, %v409_v28 }
 0x2c8   :  { %v438_v30 = vmul.f32 1.442695, %v429_v29 }
 0x2c9   :  { %v406_v31 = vpop.xlane.xlu1 %405 }
 0x2ca   :  { %2691 = vpow2.f32 %v438_v30  ;;  %v428_v35 = vsub.f32 %v364_v56, %v406_v31  ;;  %v412_v36 = vpop.xlane.xlu0 %411 }
 0x2cb   :  { %v430_v37 = vsub.f32 %v374_v60, %v412_v36 }
 0x2cc   :  { %v436_v38 = vmul.f32 1.442695, %v428_v35 }
 0x2cd   :  { %v440_v42 = vmul.f32 1.442695, %v430_v37  ;;  %v415_v43 = vpop.xlane.xlu1 %414 }
 0x2ce   :  { %2693 = vpow2.f32 %v436_v38  ;;  %v431_v45 = vsub.f32 %v2475_v59, %v415_v43 }
 0x2cf   :  { %2695 = vpow2.f32 %v440_v42 }
 0x2d0   :  { %v442_v46 = vmul.f32 1.442695, %v431_v45 }
 0x2d1   :  { %v424_v47 = vpop.xlane.xlu1 %423 }
 0x2d2   :  { %2697 = vpow2.f32 %v442_v46  ;;  %v434_v1 = vsub.f32 %v3111_v57, %v424_v47 }
 0x2d4   :  { %v3161_v48 = vpop.eup %2691  ;;  %v448_v19 = vmul.f32 1.442695, %v434_v1 }
 0x2d5   :  { %v427_v49 = vpop.xlane.xlu1 %426  ;;  %v455_v50 = vsel %vm403_vm1, %v3161_v48, 0.0  ;;  %v797_v53 = vpop.xlane.xlu0 %796 }
 0x2d6   :  { %456 = vadd.xlane.f32.xlu0 %v455_v50  ;;  %v435_v52 = vsub.f32 %v3109_v55, %v427_v49  ;;  %v813_v15 = vsub.f32 %v3127_v7, %v797_v53 }
 0x2d8   :  { %v3165_v51 = vpop.eup %2693  ;;  %v450_v61 = vmul.f32 1.442695, %v435_v52  ;;  %v824_v23 = vmul.f32 1.442695, %v813_v15 }
 0x2d9   :  { %v421_v54 = vpop.xlane.xlu1 %420  ;;  %v452_v56 = vsel %vm403_vm1, %v3165_v51, 0.0  ;;  %v3170_v58 = vpop.eup %2695 }
 0x2da   :  { %v433_v59 = vsub.f32 %v3116_v63, %v421_v54  ;;  %453 = vadd.xlane.f32.xlu1 %v452_v56  ;;  %v458_v9 = vsel %vm403_vm1, %v3170_v58, 0.0  ;;  %v803_v63 = vpop.xlane.xlu0 %802 }
 0x2db   :  { %v815_v24 = vsub.f32 %v3135_v13, %v803_v63 }
 0x2dc   :  { %v3173_v60 = vpop.eup %2697  ;;  %v446_v62 = vmul.f32 1.442695, %v433_v59 }
 0x2dd   :  { %v418_v4 = vpop.xlane.xlu1 %417  ;;  %v461_v55 = vsel %vm403_vm1, %v3173_v60, 0.0  ;;  %v828_v7 = vmul.f32 1.442695, %v815_v24 }
 0x2de   :  { %2699 = vpow2.f32 %v446_v62  ;;  %v432_v10 = vsub.f32 %v3118_v0, %v418_v4  ;;  %462 = vadd.xlane.f32.xlu0 %v461_v55  ;;  %459 = vadd.xlane.f32.xlu1 %v458_v9  ;;  %v809_v26 = vpop.xlane.xlu0 %808 }
 0x2df   :  { %2701 = vpow2.f32 %v450_v61  ;;  %v817_v29 = vsub.f32 %v3143_v17, %v809_v26 }
 0x2e0   :  { %v444_v16 = vmul.f32 1.442695, %v432_v10 }
 0x2e1   :  { %v791_v20 = vpop.xlane.xlu1 %790  ;;  %v832_v36 = vmul.f32 1.442695, %v817_v29 }
 0x2e2   :  { %v811_v57 = vsub.f32 %v3121_v2, %v791_v20  ;;  %2703 = vpow2.f32 %v444_v16 }
 0x2e3   :  { %2705 = vpow2.f32 %v448_v19 }
 0x2e4   :  { %v820_v25 = vmul.f32 1.442695, %v811_v57 }
 0x2e5   :  { %v788_v27 = vpop.xlane.xlu1 %787 }
 0x2e6   :  { %2707 = vpow2.f32 %v820_v25  ;;  %v810_v0 = vsub.f32 %v3123_v3, %v788_v27 }
 0x2e7   :  { %2709 = vpow2.f32 %v824_v23 }
 0x2e8   :  { %v3185_v28 = vpop.eup %2699  ;;  %v818_v30 = vmul.f32 1.442695, %v810_v0 }
 0x2e9   :  { %v794_v31 = vpop.xlane.xlu1 %793  ;;  %v467_v2 = vsel %vm403_vm1, %v3185_v28, 0.0  ;;  %v3190_v35 = vpop.eup %2701 }
 0x2ea   :  { %2711 = vpow2.f32 %v818_v30  ;;  %v812_v13 = vsub.f32 %v3129_v8, %v794_v31  ;;  %468 = vadd.xlane.f32.xlu0 %v467_v2  ;;  %v473_v17 = vsel %vm403_vm1, %v3190_v35, 0.0 }
 0x2eb   :  { %2713 = vpow2.f32 %v828_v7 }
 0x2ec   :  { %v822_v3 = vmul.f32 1.442695, %v812_v13  ;;  %v3193_v37 = vpop.eup %2703 }
 0x2ed   :  { %v800_v38 = vpop.xlane.xlu1 %799  ;;  %v464_v43 = vsel %vm403_vm1, %v3193_v37, 0.0  ;;  %v3200_v45 = vpop.eup %2705 }
 0x2ee   :  { %2715 = vpow2.f32 %v822_v3  ;;  %v814_v42 = vsub.f32 %v3137_v14, %v800_v38  ;;  %474 = vadd.xlane.f32.xlu0 %v473_v17  ;;  %465 = vadd.xlane.f32.xlu1 %v464_v43  ;;  %v470_v52 = vsel %vm403_vm1, %v3200_v45, 0.0 }
 0x2ef   :  { %2717 = vpow2.f32 %v832_v36 }
 0x2f0   :  { %v3202_v8 = vpop.eup %2707  ;;  %v826_v46 = vmul.f32 1.442695, %v814_v42 }
 0x2f1   :  { %v806_v47 = vpop.xlane.xlu1 %805  ;;  %v837_v49 = vsel %vm403_vm1, %v3202_v8, 0.0  ;;  %v3206_v50 = vpop.eup %2709 }
 0x2f2   :  { %2719 = vpow2.f32 %v826_v46  ;;  %v816_v14 = vsub.f32 %v3145_v18, %v806_v47  ;;  %838 = vadd.xlane.f32.xlu0 %v837_v49  ;;  %471 = vadd.xlane.f32.xlu1 %v470_v52  ;;  %v843_v56 = vsel %vm403_vm1, %v3206_v50, 0.0 }
 0x2f4   :  { %v3211_v53 = vpop.eup %2711  ;;  %v830_v54 = vmul.f32 1.442695, %v816_v14 }
 0x2f5   :  { %v834_v59 = vsel %vm403_vm1, %v3211_v53, 0.0  ;;  %v3217_v61 = vpop.eup %2713 }
 0x2f6   :  { %2721 = vpow2.f32 %v830_v54  ;;  %844 = vadd.xlane.f32.xlu0 %v843_v56  ;;  %835 = vadd.xlane.f32.xlu1 %v834_v59  ;;  %v849_v62 = vsel %vm403_vm1, %v3217_v61, 0.0 }
 0x2f8   :  { %v3219_v18 = vpop.eup %2715 }
 0x2f9   :  { %v840_v1 = vsel %vm403_vm1, %v3219_v18, 0.0  ;;  %v3225_v4 = vpop.eup %2717 }
 0x2fa   :  { %850 = vadd.xlane.f32.xlu0 %v849_v62  ;;  %841 = vadd.xlane.f32.xlu1 %v840_v1  ;;  %v855_v9 = vsel %vm403_vm1, %v3225_v4, 0.0 }
 0x2fc   :  { %v3227_v55 = vpop.eup %2719 }
 0x2fd   :  { %v846_v10 = vsel %vm403_vm1, %v3227_v55, 0.0 }
 0x2fe   :  { %856 = vadd.xlane.f32.xlu0 %v855_v9  ;;  %847 = vadd.xlane.f32.xlu1 %v846_v10 }
 0x300   :  { %v3233_v63 = vpop.eup %2721 }
 0x301   :  { %v852_v15 = vsel %vm403_vm1, %v3233_v63, 0.0 }
 0x302   :  { %853 = vadd.xlane.f32.xlu1 %v852_v15 }
 0x363   :  { %v457_v16 = vpop.xlane.xlu0 %456 }
 0x364   :  { %2723 = vrcp.f32 %v457_v16 }
 0x367   :  { %v454_v19 = vpop.xlane.xlu1 %453 }
 0x368   :  { %2725 = vrcp.f32 %v454_v19 }
 0x36b   :  { %v463_v20 = vpop.xlane.xlu0 %462  ;;  %v460_v57 = vpop.xlane.xlu1 %459 }
 0x36c   :  { %2727 = vrcp.f32 %v463_v20 }
 0x36d   :  { %2729 = vrcp.f32 %v460_v57 }
 0x36e   :  { %v2724_v23 = vpop.eup %2723 }
 0x36f   :  { %v485_v26 = vmul.f32 %v2724_v23, %v3161_v48 }
 0x372   :  { %v2726_v24 = vpop.eup %2725 }
 0x373   :  { %v484_v25 = vmul.f32 %v2726_v24, %v3165_v51 }
 0x375   :  { %2484 = vmatprep.mubr.msk.f32.mxu1 %vm403_vm1, %v484_v25 }
 0x376   :  { %v2728_v27 = vpop.eup %2727  ;;  %2485 = vmatmul.mubr.msk.f32.vlgmr.msra.gmra.mrb[4].mxu1 %vm403_vm1, %v485_v26 }
 0x377   :  { %v2730_v0 = vpop.eup %2729  ;;  %2511 = vmatpush3.msra.mxu1 %v3069_v40  ;;  %v469_v7 = vpop.xlane.xlu0 %468  ;;  %v487_v29 = vmul.f32 %v2728_v27, %v3173_v60 }
 0x378   :  { %v486_v30 = vmul.f32 %v2730_v0, %v3170_v58  ;;  %2731 = vrcp.f32 %v469_v7 }
 0x37a   :  { %2487 = vmatprep.mubr.msk.f32.mxu1 %vm403_vm1, %v486_v30 }
 0x37b   :  { %2488 = vmatmul.mubr.msk.f32.gmra.mrb[6].mxu1 %vm403_vm1, %v487_v29  ;;  %v475_v51 = vpop.xlane.xlu0 %474  ;;  %v466_v48 = vpop.xlane.xlu1 %465 }
 0x37c   :  { %2733 = vrcp.f32 %v466_v48 }
 0x37d   :  { %2735 = vrcp.f32 %v475_v51 }
 0x37f   :  { %v839_v31 = vpop.xlane.xlu0 %838  ;;  %v472_v2 = vpop.xlane.xlu1 %471 }
 0x380   :  { %2737 = vrcp.f32 %v472_v2 }
 0x381   :  { %2739 = vrcp.f32 %v839_v31 }
 0x382   :  { %v2732_v36 = vpop.eup %2731 }
 0x383   :  { %v845_v13 = vpop.xlane.xlu0 %844  ;;  %v836_v40 = vpop.xlane.xlu1 %835  ;;  %v489_v17 = vmul.f32 %v2732_v36, %v3185_v28 }
 0x384   :  { %2741 = vrcp.f32 %v836_v40 }
 0x385   :  { %2743 = vrcp.f32 %v845_v13 }
 0x386   :  { %v2734_v60 = vpop.eup %2733 }
 0x387   :  { %v851_v3 = vpop.xlane.xlu0 %850  ;;  %v842_v58 = vpop.xlane.xlu1 %841  ;;  %v488_v38 = vmul.f32 %v2734_v60, %v3193_v37 }
 0x388   :  { %2745 = vrcp.f32 %v842_v58  ;;  %v2736_v42 = vpop.eup %2735 }
 0x389   :  { %2490 = vmatprep.mubr.msk.f32.mxu1 %vm403_vm1, %v488_v38  ;;  %2747 = vrcp.f32 %v851_v3  ;;  %v491_v14 = vmul.f32 %v2736_v42, %v3190_v35 }
 0x38a   :  { %v2738_v43 = vpop.eup %2737  ;;  %2491 = vmatmul.mubr.msk.f32.gmra.mrb[8].mxu1 %vm403_vm1, %v489_v17 }
 0x38b   :  { %v848_v46 = vpop.xlane.xlu1 %847  ;;  %v490_v47 = vmul.f32 %v2738_v43, %v3200_v45  ;;  %v857_v49 = vpop.xlane.xlu0 %856 }
 0x38c   :  { %2749 = vrcp.f32 %v848_v46  ;;  %v2740_v52 = vpop.eup %2739 }
 0x38d   :  { %2493 = vmatprep.mubr.msk.f32.mxu1 %vm403_vm1, %v490_v47  ;;  %2751 = vrcp.f32 %v857_v49  ;;  %v867_v56 = vmul.f32 %v2740_v52, %v3202_v8 }
 0x38e   :  { %v2742_v37 = vpop.eup %2741  ;;  %2494 = vmatmul.mubr.msk.f32.gmra.mrb[10].mxu1 %vm403_vm1, %v491_v14 }
 0x38f   :  { %v854_v28 = vpop.xlane.xlu1 %853  ;;  %v866_v54 = vmul.f32 %v2742_v37, %v3211_v53  ;;  %v2744_v59 = vpop.eup %2743 }
 0x390   :  { %2753 = vrcp.f32 %v854_v28  ;;  %v869_v62 = vmul.f32 %v2744_v59, %v3206_v50 }
 0x391   :  { %2512 = vmatprep.mubr.msk.f32.mxu1 %vm403_vm1, %v866_v54 }
 0x392   :  { %v2746_v45 = vpop.eup %2745  ;;  %2513 = vmatmul.mubr.msk.f32.vlgmr.msra.gmra.mrb[12].mxu1 %vm403_vm1, %v867_v56 }
 0x393   :  { %v868_v35 = vmul.f32 %v2746_v45, %v3219_v18  ;;  %v2748_v1 = vpop.eup %2747 }
 0x394   :  { %v871_v8 = vmul.f32 %v2748_v1, %v3217_v61  ;;  %v1027_v61 = vld [vmem:[%s3698_s10 + $0x8] sm:$0xff] }
 0x395   :  { %2515 = vmatprep.mubr.msk.f32.mxu1 %vm403_vm1, %v868_v35 }
 0x396   :  { %v2750_v9 = vpop.eup %2749  ;;  %2516 = vmatmul.mubr.msk.f32.gmra.mrb[14].mxu1 %vm403_vm1, %v869_v62 }
 0x397   :  { %v870_v53 = vmul.f32 %v2750_v9, %v3227_v55  ;;  %v2752_v10 = vpop.eup %2751  ;;  %v1026_v55 = vld [vmem:[%s3698_s10] sm:$0xff] }
 0x398   :  { %v873_v50 = vmul.f32 %v2752_v10, %v3225_v4  ;;  %v2640_v16 = vpack.c.bf16 %v1027_v61, %v1026_v55  ;;  %v1029_v4 = vld [vmem:[%s3698_s10 + $0x18] sm:$0xff] }
 0x399   :  { %2518 = vmatprep.mubr.msk.f32.mxu1 %vm403_vm1, %v870_v53 }
 0x39a   :  { %v2754_v15 = vpop.eup %2753  ;;  %2519 = vmatmul.mubr.msk.f32.gmra.mrb[16].mxu1 %vm403_vm1, %v871_v8  ;;  %2641 = vmatprep.subr.bf16.mxu0 %v2640_v16 }
 0x39b   :  { %v872_v18 = vmul.f32 %v2754_v15, %v3233_v63  ;;  %2643 = vmatpush3.bf16.msra.mxu0 %v2640_v16  ;;  %v1028_v63 = vld [vmem:[%s3698_s10 + $0x10] sm:$0xff] }
 0x39c   :  { %v2644_v19 = vpack.c.bf16 %v1029_v4, %v1028_v63 }
 0x39d   :  { %2521 = vmatprep.mubr.msk.f32.mxu1 %vm403_vm1, %v872_v18 }
 0x39e   :  { %2522 = vmatmul.mubr.msk.f32.gmra.mrb[18].mxu1 %vm403_vm1, %v873_v50  ;;  %2645 = vmatprep.subr.bf16.mxu0 %v2644_v19 }
 0x39f   :  { %2647 = vmatpush3.bf16.msra.mxu0 %v2644_v19 }
 0x449   :  { %v2486_v20 = vpop.f32.mrb[4].mxu1 }
 0x44a   :  { %v622_v57 = vmul.f32 %v2486_v20, %v3045_v32  ;;  %v582_v23 = vpop.f32.mrb[5].mxu1 }
 0x44b   :  { %v621_v24 = vmul.f32 %v582_v23, %v3028_v21 }
 0x44c   :  { %v630_v25 = vsel %vm87_vm0, %v622_v57, 0.0 }
 0x44d   :  { %v629_v26 = vsel %vm87_vm0, %v621_v24, 0.0 }
 0x44e   :  { %v631_v27 = vadd.f32 %v630_v25, %v629_v26  ;;  %v2489_v0 = vpop.f32.mrb[6].mxu1 }
 0x44f   :  { %v592_v7 = vpop.f32.mrb[7].mxu1  ;;  %v624_v29 = vmul.f32 %v2489_v0, %v3067_v39 }
 0x450   :  { %v623_v30 = vmul.f32 %v592_v7, %v3057_v34 }
 0x451   :  { %v634_v31 = vsel %vm87_vm0, %v624_v29, 0.0 }
 0x452   :  { %v632_v51 = vsel %vm87_vm0, %v623_v30, 0.0  ;;  %v2286_v30 = vld [vmem:[%s3699_s11] ss:$0 sm:$0xff] }
 0x453   :  { %v633_v48 = vadd.f32 %v632_v51, %v631_v27 }
 0x455   :  { %v635_v2 = vadd.f32 %v634_v31, %v633_v48 }
 0x45d   :  { %v2492_v13 = vpop.f32.mrb[8].mxu1 }
 0x45e   :  { %v602_v40 = vpop.f32.mrb[9].mxu1  ;;  %v626_v36 = vmul.f32 %v2492_v13, %v3086_v44 }
 0x45f   :  { %v625_v60 = vmul.f32 %v602_v40, %v3076_v41 }
 0x460   :  { %v638_v42 = vsel %vm87_vm0, %v626_v36, 0.0 }
 0x461   :  { %v636_v3 = vsel %vm87_vm0, %v625_v60, 0.0  ;;  %v2495_v58 = vpop.f32.mrb[10].mxu1 }
 0x462   :  { %v637_v38 = vadd.f32 %v636_v3, %v635_v2  ;;  %v612_v17 = vpop.f32.mrb[11].mxu1  ;;  %v628_v43 = vmul.f32 %v2495_v58, %v3050_v33 }
 0x463   :  { %v627_v46 = vmul.f32 %v612_v17, %v3033_v22 }
 0x464   :  { %v639_v47 = vadd.f32 %v638_v42, %v637_v38  ;;  %v642_v54 = vsel %vm87_vm0, %v628_v43, 0.0 }
 0x465   :  { %v640_v49 = vsel %vm87_vm0, %v627_v46, 0.0  ;;  %v2514_v14 = vpop.f32.mrb[12].mxu1 }
 0x466   :  { %v641_v52 = vadd.f32 %v640_v49, %v639_v47  ;;  %v1004_v37 = vmul.f32 %v2514_v14, %v3045_v32  ;;  %v964_v28 = vpop.f32.mrb[13].mxu1  ;;  %v1272_v14 = vld [vmem:[%s3704_s16 + $0x8] sm:$0xff] }
 0x467   :  { %v1003_v56 = vmul.f32 %v964_v28, %v3028_v21  ;;  %v1274_v28 = vld [vmem:[%s3704_s16 + $0x18] sm:$0xff] }
 0x468   :  { %v643_v59 = vadd.f32 %v642_v54, %v641_v52  ;;  %v1012_v45 = vsel %vm87_vm0, %v1004_v37, 0.0  ;;  %v1273_v37 = vld [vmem:[%s3704_s16 + $0x10] sm:$0xff] }
 0x469   :  { %v1011_v35 = vsel %vm87_vm0, %v1003_v56, 0.0  ;;  %v2517_v62 = vpop.f32.mrb[14].mxu1  ;;  %v2660_v54 = vpack.c.bf16 %v1274_v28, %v1273_v37  ;;  %v3340_v56 = vld [vmem:[%s3718_s26] sm:$0xff] }
 0x46a   :  { %v1013_v1 = vadd.f32 %v1012_v45, %v1011_v35  ;;  %v974_v9 = vpop.f32.mrb[15].mxu1  ;;  %2532 = vmatprep.mubr.msk.f32.mxu0 %vm87_vm0, %v643_v59  ;;  %v1006_v53 = vmul.f32 %v2517_v62, %v3067_v39  ;;  %v1263_v59 = vld [vmem:[%s3719_s29] sm:$0xff]  ;;  %v1172_v35 = vld [vmem:[%s3702_s14 + $0x8] sm:$0xff] }
 0x46b   :  { %v1005_v8 = vmul.f32 %v974_v9, %v3057_v34  ;;  %v1171_v45 = vld [vmem:[%s3702_s14] sm:$0xff]  ;;  %v1267_v62 = vadd.f32 %v1263_v59, %v3340_v56 }
 0x46c   :  { %v1016_v55 = vsel %vm87_vm0, %v1006_v53, 0.0  ;;  %v2648_v9 = vpack.c.bf16 %v1172_v35, %v1171_v45  ;;  %v1264_v53 = vld [vmem:[%s3719_s29 + $0x8] sm:$0xff] }
 0x46d   :  { %v1014_v10 = vsel %vm87_vm0, %v1005_v8, 0.0  ;;  %v2520_v15 = vpop.f32.mrb[16].mxu1  ;;  %v1173_v8 = vld [vmem:[%s3702_s14 + $0x10] sm:$0xff] }
 0x46e   :  { %v1015_v18 = vadd.f32 %v1014_v10, %v1013_v1  ;;  %v984_v50 = vpop.f32.mrb[17].mxu1  ;;  %v1008_v61 = vmul.f32 %v2520_v15, %v3086_v44  ;;  %v3355_v1 = vld [vmem:[%s3718_s26 + $0x8] sm:$0xff]  ;;  %v1174_v10 = vld [vmem:[%s3702_s14 + $0x18] sm:$0xff]  ;;  %2649 = vmatprep.subr.bf16.mxu1 %v2648_v9 }
 0x46f   :  { %v1007_v16 = vmul.f32 %v984_v50, %v3076_v41  ;;  %v1268_v15 = vadd.f32 %v1264_v53, %v3355_v1  ;;  %2651 = vmatpush3.bf16.msra.mxu1 %v2648_v9  ;;  %v3372_v50 = vld [vmem:[%s3718_s26 + $0x10] sm:$0xff] }
 0x470   :  { %v1017_v63 = vadd.f32 %v1016_v55, %v1015_v18  ;;  %v1020_v23 = vsel %vm87_vm0, %v1008_v61, 0.0  ;;  %v2652_v18 = vpack.c.bf16 %v1174_v10, %v1173_v8  ;;  %v1265_v55 = vld [vmem:[%s3719_s29 + $0x10] sm:$0xff] }
 0x471   :  { %v1018_v4 = vsel %vm87_vm0, %v1007_v16, 0.0  ;;  %v2523_v19 = vpop.f32.mrb[18].mxu1  ;;  %v1269_v61 = vadd.f32 %v1265_v55, %v3372_v50  ;;  %v3381_v16 = vld [vmem:[%s3718_s26 + $0x18] sm:$0xff] }
 0x472   :  { %v1019_v20 = vadd.f32 %v1018_v4, %v1017_v63  ;;  %v994_v57 = vpop.f32.mrb[19].mxu1  ;;  %v1010_v24 = vmul.f32 %v2523_v19, %v3050_v33  ;;  %2653 = vmatprep.subr.bf16.mxu1 %v2652_v18  ;;  %v1266_v63 = vld [vmem:[%s3719_s29 + $0x18] sm:$0xff] }
 0x473   :  { %v1009_v25 = vmul.f32 %v994_v57, %v3033_v22  ;;  %2655 = vmatpush3.bf16.msra.mxu1 %v2652_v18  ;;  %v1270_v4 = vadd.f32 %v1266_v63, %v3381_v16 }
 0x474   :  { %v1021_v26 = vadd.f32 %v1020_v23, %v1019_v20  ;;  %v1024_v7 = vsel %vm87_vm0, %v1010_v24, 0.0 }
 0x475   :  { %v1022_v27 = vsel %vm87_vm0, %v1009_v25, 0.0 }
 0x476   :  { %v1023_v0 = vadd.f32 %v1022_v27, %v1021_v26  ;;  %v2289_v27 = vld [vmem:[%s3700_s12] ss:$0 sm:$0xff] }
 0x478   :  { %v1025_v29 = vadd.f32 %v1024_v7, %v1023_v0 }
 0x47a   :  { %2533 = vmatmul.mubr.msk.f32.vlgmr.msra.gmra.mrb[16].mxu0 %vm87_vm0, %v1025_v29 }
 0x47b   :  { %2554 = vmatprep.mubr.msk.f32.mxu0 %vm87_vm0, %v1267_v62 }
 0x54d   :  { %v2534_v51 = vpop.f32.mrb[16].mxu0 }
 0x54e   :  { %v1115_v48 = vadd.f32 %v2534_v51, %v2286_v30  ;;  %v1109_v31 = vpop.f32.mrb[17].mxu0 }
 0x54f   :  { %v1110_v2 = vadd.f32 %v2286_v30, %v1109_v31  ;;  %v2290_v30 = vld [vmem:[%s3701_s13] ss:$0 sm:$0xff] }
 0x550   :  { %v1119_v13 = vadd.f32 %v1115_v48, %v3004_v11 }
 0x551   :  { %v1118_v40 = vadd.f32 %v1110_v2, %v2983_v5  ;;  %v1271_v5 = vld [vmem:[%s3704_s16] sm:$0xff] }
 0x552   :  { %v1123_v36 = vsel %vm87_vm0, %v1119_v13, 0.0  ;;  %v2656_v52 = vpack.c.bf16 %v1272_v14, %v1271_v5 }
 0x553   :  { %1124 = vadd.xlane.f32.xlu0 %v1123_v36  ;;  %v1120_v60 = vsel %vm87_vm0, %v1118_v40, 0.0  ;;  %v2294_v36 = vld [vmem:[%s3705_s17] ss:$0 sm:$0xff] }
 0x554   :  { %1121 = vadd.xlane.f32.xlu1 %v1120_v60  ;;  %2657 = vmatprep.subr.bf16.mxu0 %v2656_v52 }
 0x555   :  { %2659 = vmatpush3.bf16.msra.mxu0 %v2656_v52 }
 0x556   :  { %2661 = vmatprep.subr.bf16.mxu0 %v2660_v54 }
 0x559   :  { %2663 = vmatpush3.bf16.msra.mxu0 %v2660_v54 }
 0x55c   :  { %2555 = vmatmul.mubr.msk.f32.vlgmr.msra.gmra.mrb[18].mxu0 %vm87_vm0, %v1268_v15 }
 0x55d   :  { %2557 = vmatprep.mubr.msk.f32.mxu0 %vm87_vm0, %v1269_v61 }
 0x560   :  { %2558 = vmatmul.mubr.msk.f32.gmra.mrb[20].mxu0 %vm87_vm0, %v1270_v4 }
 0x5e0   :  { %v1125_v3 = vpop.xlane.xlu0 %1124 }
 0x5e1   :  { %v1128_v58 = vmul.f32 0.03125, %v1125_v3  ;;  %v1122_v38 = vpop.xlane.xlu1 %1121 }
 0x5e2   :  { %v1127_v17 = vmul.f32 0.03125, %v1122_v38 }
 0x5e3   :  { %v1130_v42 = vsub.f32 %v1119_v13, %v1128_v58 }
 0x5e4   :  { %v1129_v43 = vsub.f32 %v1118_v40, %v1127_v17 }
 0x5e5   :  { %v1132_v46 = vmul.f32 %v1130_v42, %v1130_v42 }
 0x5e6   :  { %v1131_v47 = vmul.f32 %v1129_v43, %v1129_v43 }
 0x5e7   :  { %v1136_v49 = vsel %vm87_vm0, %v1132_v46, 0.0 }
 0x5e8   :  { %1137 = vadd.xlane.f32.xlu0 %v1136_v49  ;;  %v1133_v11 = vsel %vm87_vm0, %v1131_v47, 0.0  ;;  %v2291_v49 = vld [vmem:[%s3703_s15] ss:$0 sm:$0xff] }
 0x5e9   :  { %1134 = vadd.xlane.f32.xlu1 %v1133_v11 }
 0x62f   :  { %v2556_v60 = vpop.f32.mrb[18].mxu0 }
 0x630   :  { %v1366_v3 = vadd.f32 %v2556_v60, %v2294_v36  ;;  %v1360_v58 = vpop.f32.mrb[19].mxu0 }
 0x631   :  { %v1361_v38 = vadd.f32 %v2294_v36, %v1360_v58 }
 0x675   :  { %v1138_v19 = vpop.xlane.xlu0 %1137 }
 0x676   :  { %v1140_v20 = vmul.f32 0.03125, %v1138_v19  ;;  %v1135_v57 = vpop.xlane.xlu1 %1134 }
 0x677   :  { %v1139_v23 = vmul.f32 0.03125, %v1135_v57 }
 0x678   :  { %v1142_v24 = vadd.f32 1e-05, %v1140_v20 }
 0x679   :  { %v1141_v25 = vadd.f32 1e-05, %v1139_v23 }
 0x67a   :  { %2755 = vrsqrt.f32 %v1142_v24 }
 0x67b   :  { %2757 = vrsqrt.f32 %v1141_v25 }
 0x684   :  { %v2756_v26 = vpop.eup %2755 }
 0x685   :  { %v2758_v0 = vpop.eup %2757  ;;  %v1146_v7 = vmul.f32 %v2756_v26, %v1130_v42 }
 0x686   :  { %v1145_v29 = vmul.f32 %v2758_v0, %v1129_v43 }
 0x687   :  { %v1155_v51 = vmul.f32 %v2289_v27, %v1146_v7 }
 0x688   :  { %v1154_v48 = vmul.f32 %v2289_v27, %v1145_v29 }
 0x689   :  { %v1164_v31 = vadd.f32 %v2290_v30, %v1155_v51 }
 0x68a   :  { %v1163_v2 = vadd.f32 %v2290_v30, %v1154_v48 }
 0x68b   :  { %v1170_v40 = vadd.f32 %v1164_v31, %v3009_v12  ;;  %v2559_v12 = vpop.f32.mrb[20].mxu0 }
 0x68c   :  { %v1169_v13 = vadd.f32 %v1163_v2, %v2988_v6  ;;  %v2664_v6 = vpack.c.bf16 %v1366_v3, %v1361_v38  ;;  %v1376_v42 = vadd.f32 %v2559_v12, %v2294_v36  ;;  %v1370_v43 = vpop.f32.mrb[21].mxu0 }
 0x68d   :  { %v1371_v46 = vadd.f32 %v2294_v36, %v1370_v43 }
 0x68e   :  { %2543 = vmatprep.mubr.msk.f32.mxu1 %vm87_vm0, %v1169_v13  ;;  %2666 = vmatprep.subr.msk.bf16.mxu1 %vm3404_vm2, %v2664_v6 }
 0x68f   :  { %2544 = vmatmul.mubr.msk.f32.vlgmr.msra.gmra.mrb[20].mxu1 %vm87_vm0, %v1170_v40  ;;  %v2674_v47 = vpack.c.bf16 %v1376_v42, %v1371_v46 }
 0x690   :  { %2669 = vmatpush3.bf16.xpose.msk.msra.mxu1 %vm3404_vm2, %v2664_v6 }
 0x691   :  { %2676 = vmatprep.subr.msk.bf16.mxu1 %vm3404_vm2, %v2674_v47 }
 0x762   :  { %v2545_v11 = vpop.f32.mrb[20].mxu1 }
 0x763   :  { %v1254_v5 = vpop.f32.mrb[21].mxu1  ;;  %v1260_v35 = vadd.f32 %v2545_v11, %v2291_v49 }
 0x764   :  { %v1255_v14 = vadd.f32 %v2291_v49, %v1254_v5 }
 0x765   :  { %v1782_v53 = vmul.f32 %v1260_v35, %v3028_v21  ;;  %v1783_v8 = vmul.f32 %v1260_v35, %v3045_v32  ;;  %v1784_v10 = vmul.f32 %v1260_v35, %v3057_v34  ;;  %v1785_v15 = vmul.f32 %v1260_v35, %v3067_v39 }
 0x766   :  { %v1380_v52 = vmul.f32 %v1255_v14, %v3028_v21  ;;  %v1381_v37 = vmul.f32 %v1255_v14, %v3045_v32  ;;  %v1382_v28 = vmul.f32 %v1255_v14, %v3057_v34  ;;  %v1383_v54 = vmul.f32 %v1255_v14, %v3067_v39 }
 0x767   :  { %v1384_v59 = vmul.f32 %v1255_v14, %v3076_v41  ;;  %v1385_v45 = vmul.f32 %v1255_v14, %v3086_v44  ;;  %v1386_v62 = vmul.f32 %v1255_v14, %v3033_v22  ;;  %v1387_v9 = vmul.f32 %v1255_v14, %v3050_v33 }
 0x768   :  { %2564 = vmatprep.mubr.msk.f32.mxu1 %vm87_vm0, %v1380_v52  ;;  %v1786_v18 = vmul.f32 %v1260_v35, %v3076_v41  ;;  %v1787_v21 = vmul.f32 %v1260_v35, %v3086_v44  ;;  %v1788_v55 = vmul.f32 %v1260_v35, %v3033_v22  ;;  %v1789_v32 = vmul.f32 %v1260_v35, %v3050_v33 }
 0x769   :  { %2565 = vmatmul.mubr.msk.f32.vlgmr.msra.gmra.mrb[22].mxu1 %vm87_vm0, %v1381_v37 }
 0x76a   :  { %2679 = vmatpush3.bf16.xpose.msk.msra.mxu1 %vm3404_vm2, %v2674_v47  ;;  %2567 = vmatprep.mubr.msk.f32.mxu1 %vm87_vm0, %v1382_v28 }
 0x76d   :  { %2568 = vmatmul.mubr.msk.f32.gmra.mrb[24].mxu1 %vm87_vm0, %v1383_v54 }
 0x76e   :  { %2570 = vmatprep.mubr.msk.f32.mxu1 %vm87_vm0, %v1384_v59 }
 0x771   :  { %2571 = vmatmul.mubr.msk.f32.gmra.mrb[26].mxu1 %vm87_vm0, %v1385_v45 }
 0x772   :  { %2573 = vmatprep.mubr.msk.f32.mxu1 %vm87_vm0, %v1386_v62 }
 0x775   :  { %2574 = vmatmul.mubr.msk.f32.gmra.mrb[28].mxu1 %vm87_vm0, %v1387_v9 }
 0x776   :  { %2596 = vmatprep.mubr.msk.f32.mxu1 %vm87_vm0, %v1782_v53 }
 0x779   :  { %2597 = vmatmul.mubr.msk.f32.vlgmr.msra.gmra.mrb[30].mxu1 %vm87_vm0, %v1783_v8 }
 0x77a   :  { %2599 = vmatprep.mubr.msk.f32.mxu1 %vm87_vm0, %v1784_v10 }
 0x77d   :  { %2600 = vmatmul.mubr.msk.f32.gmra.mrb[32].mxu1 %vm87_vm0, %v1785_v15 }
 0x77e   :  { %2602 = vmatprep.mubr.msk.f32.mxu1 %vm87_vm0, %v1786_v18 }
 0x781   :  { %2603 = vmatmul.mubr.msk.f32.gmra.mrb[34].mxu1 %vm87_vm0, %v1787_v21 }
 0x782   :  { %2605 = vmatprep.mubr.msk.f32.mxu1 %vm87_vm0, %v1788_v55 }
 0x785   :  { %2606 = vmatmul.mubr.msk.f32.gmra.mrb[36].mxu1 %vm87_vm0, %v1789_v32 }
 0x83c   :  { %v2566_v34 = vpop.f32.mrb[22].mxu1 }
 0x83d   :  { %v1484_v39 = vpop.f32.mrb[23].mxu1  ;;  %v1527_v41 = vsel %vm1523_vm3, %v2566_v34, -inf }
 0x83e   :  { %1528 = vmax.xlane.f32.xlu0 %v1527_v41  ;;  %v1524_v61 = vsel %vm1523_vm3, %v1484_v39, -inf }
 0x83f   :  { %1525 = vmax.xlane.f32.xlu1 %v1524_v61 }
 0x840   :  { %v2569_v44 = vpop.f32.mrb[24].mxu1 }
 0x841   :  { %v1494_v63 = vpop.f32.mrb[25].mxu1  ;;  %v1533_v22 = vsel %vm1523_vm3, %v2569_v44, -inf }
 0x842   :  { %1534 = vmax.xlane.f32.xlu0 %v1533_v22  ;;  %v1530_v4 = vsel %vm1523_vm3, %v1494_v63, -inf }
 0x843   :  { %1531 = vmax.xlane.f32.xlu1 %v1530_v4 }
 0x844   :  { %v2572_v33 = vpop.f32.mrb[26].mxu1 }
 0x845   :  { %v1504_v19 = vpop.f32.mrb[27].mxu1  ;;  %v1539_v20 = vsel %vm1523_vm3, %v2572_v33, -inf }
 0x846   :  { %1540 = vmax.xlane.f32.xlu0 %v1539_v20  ;;  %v1536_v57 = vsel %vm1523_vm3, %v1504_v19, -inf }
 0x847   :  { %1537 = vmax.xlane.f32.xlu1 %v1536_v57 }
 0x848   :  { %v2575_v23 = vpop.f32.mrb[28].mxu1 }
 0x849   :  { %v1514_v24 = vpop.f32.mrb[29].mxu1  ;;  %v1545_v25 = vsel %vm1523_vm3, %v2575_v23, -inf }
 0x84a   :  { %1546 = vmax.xlane.f32.xlu0 %v1545_v25  ;;  %v1542_v26 = vsel %vm1523_vm3, %v1514_v24, -inf }
 0x84b   :  { %1543 = vmax.xlane.f32.xlu1 %v1542_v26 }
 0x84c   :  { %v3459_v27 = vpop.f32.mrb[30].mxu1 }
 0x84d   :  { %v3461_v0 = vpop.f32.mrb[31].mxu1  ;;  %v1928_v7 = vsel %vm1523_vm3, %v3459_v27, -inf }
 0x84e   :  { %1929 = vmax.xlane.f32.xlu0 %v1928_v7  ;;  %v1925_v29 = vsel %vm1523_vm3, %v3461_v0, -inf }
 0x84f   :  { %1926 = vmax.xlane.f32.xlu1 %v1925_v29 }
 0x850   :  { %v3467_v30 = vpop.f32.mrb[32].mxu1 }
 0x851   :  { %v3469_v51 = vpop.f32.mrb[33].mxu1  ;;  %v1934_v48 = vsel %vm1523_vm3, %v3467_v30, -inf }
 0x852   :  { %1935 = vmax.xlane.f32.xlu0 %v1934_v48  ;;  %v1931_v31 = vsel %vm1523_vm3, %v3469_v51, -inf }
 0x853   :  { %1932 = vmax.xlane.f32.xlu1 %v1931_v31 }
 0x854   :  { %v3475_v2 = vpop.f32.mrb[34].mxu1 }
 0x855   :  { %v3477_v13 = vpop.f32.mrb[35].mxu1  ;;  %v1940_v40 = vsel %vm1523_vm3, %v3475_v2, -inf }
 0x856   :  { %1941 = vmax.xlane.f32.xlu0 %v1940_v40  ;;  %v1937_v36 = vsel %vm1523_vm3, %v3477_v13, -inf }
 0x857   :  { %1938 = vmax.xlane.f32.xlu1 %v1937_v36 }
 0x858   :  { %v3483_v60 = vpop.f32.mrb[36].mxu1 }
 0x859   :  { %v3485_v3 = vpop.f32.mrb[37].mxu1  ;;  %v1946_v58 = vsel %vm1523_vm3, %v3483_v60, -inf }
 0x85a   :  { %1947 = vmax.xlane.f32.xlu0 %v1946_v58  ;;  %v1943_v38 = vsel %vm1523_vm3, %v3485_v3, -inf }
 0x85b   :  { %1944 = vmax.xlane.f32.xlu1 %v1943_v38 }
 0x8cb   :  { %v1529_v17 = vpop.xlane.xlu0 %1528 }
 0x8cc   :  { %v1549_v6 = vsub.f32 %v2566_v34, %v1529_v17  ;;  %v1526_v12 = vpop.xlane.xlu1 %1525 }
 0x8cd   :  { %v1548_v42 = vsub.f32 %v1484_v39, %v1526_v12 }
 0x8ce   :  { %v1558_v43 = vmul.f32 1.442695, %v1549_v6 }
 0x8cf   :  { %v1556_v46 = vmul.f32 1.442695, %v1548_v42  ;;  %v1535_v47 = vpop.xlane.xlu0 %1534 }
 0x8d0   :  { %2759 = vpow2.f32 %v1558_v43  ;;  %v1551_v49 = vsub.f32 %v2569_v44, %v1535_v47  ;;  %v1532_v11 = vpop.xlane.xlu1 %1531 }
 0x8d1   :  { %2761 = vpow2.f32 %v1556_v46  ;;  %v1550_v5 = vsub.f32 %v1494_v63, %v1532_v11 }
 0x8d2   :  { %v1562_v14 = vmul.f32 1.442695, %v1551_v49 }
 0x8d3   :  { %v1560_v52 = vmul.f32 1.442695, %v1550_v5  ;;  %v1541_v37 = vpop.xlane.xlu0 %1540 }
 0x8d4   :  { %2763 = vpow2.f32 %v1562_v14  ;;  %v1553_v28 = vsub.f32 %v2572_v33, %v1541_v37  ;;  %v1538_v54 = vpop.xlane.xlu1 %1537 }
 0x8d5   :  { %2765 = vpow2.f32 %v1560_v52  ;;  %v1552_v59 = vsub.f32 %v1504_v19, %v1538_v54 }
 0x8d6   :  { %v1566_v45 = vmul.f32 1.442695, %v1553_v28 }
 0x8d7   :  { %v1564_v35 = vmul.f32 1.442695, %v1552_v59  ;;  %v1547_v62 = vpop.xlane.xlu0 %1546 }
 0x8d8   :  { %2767 = vpow2.f32 %v1566_v45  ;;  %v1555_v9 = vsub.f32 %v2575_v23, %v1547_v62  ;;  %v1544_v53 = vpop.xlane.xlu1 %1543 }
 0x8d9   :  { %2769 = vpow2.f32 %v1564_v35  ;;  %v1554_v8 = vsub.f32 %v1514_v24, %v1544_v53  ;;  %v2670_v53 = vpack.c.bf16 %v3355_v1, %v3340_v56  ;;  %v1379_v1 = vld [vmem:[%s3692_s4] sm:$0xff] }
 0x8da   :  { %v3491_v10 = vpop.eup %2759  ;;  %v1570_v15 = vmul.f32 1.442695, %v1555_v9 }
 0x8db   :  { %v3493_v18 = vpop.eup %2761  ;;  %v1568_v21 = vmul.f32 1.442695, %v1554_v8  ;;  %v1930_v55 = vpop.xlane.xlu0 %1929  ;;  %v1575_v32 = vsel %vm1523_vm3, %v3491_v10, 0.0  ;;  %2671 = vmatprep.subr.bf16.mxu0 %v2670_v53  ;;  %v2680_v8 = vpack.c.bf16 %v3381_v16, %v3372_v50 }
 0x8dc   :  { %2771 = vpow2.f32 %v1570_v15  ;;  %v1950_v34 = vsub.f32 %v3459_v27, %v1930_v55  ;;  %1576 = vadd.xlane.f32.xlu0 %v1575_v32  ;;  %v1927_v39 = vpop.xlane.xlu1 %1926  ;;  %v1572_v41 = vsel %vm1523_vm3, %v3493_v18, 0.0  ;;  %2673 = vmatpush3.bf16.msra.mxu0 %v2670_v53 }
 0x8dd   :  { %2773 = vpow2.f32 %v1568_v21  ;;  %v1949_v61 = vsub.f32 %v3461_v0, %v1927_v39  ;;  %1573 = vadd.xlane.f32.xlu1 %v1572_v41  ;;  %2681 = vmatprep.subr.bf16.mxu0 %v2680_v8 }
 0x8de   :  { %v3501_v44 = vpop.eup %2763  ;;  %v1959_v63 = vmul.f32 1.442695, %v1950_v34 }
 0x8df   :  { %v3503_v22 = vpop.eup %2765  ;;  %v1957_v4 = vmul.f32 1.442695, %v1949_v61  ;;  %v1936_v33 = vpop.xlane.xlu0 %1935  ;;  %v1581_v19 = vsel %vm1523_vm3, %v3501_v44, 0.0 }
 0x8e0   :  { %2775 = vpow2.f32 %v1959_v63  ;;  %v1952_v20 = vsub.f32 %v3467_v30, %v1936_v33  ;;  %1582 = vadd.xlane.f32.xlu0 %v1581_v19  ;;  %v1933_v57 = vpop.xlane.xlu1 %1932  ;;  %v1578_v23 = vsel %vm1523_vm3, %v3503_v22, 0.0 }
 0x8e1   :  { %2777 = vpow2.f32 %v1957_v4  ;;  %v1951_v24 = vsub.f32 %v3469_v51, %v1933_v57  ;;  %1579 = vadd.xlane.f32.xlu1 %v1578_v23 }
 0x8e2   :  { %v3511_v25 = vpop.eup %2767  ;;  %v1963_v26 = vmul.f32 1.442695, %v1952_v20 }
 0x8e3   :  { %v3513_v27 = vpop.eup %2769  ;;  %v1961_v0 = vmul.f32 1.442695, %v1951_v24  ;;  %v1942_v7 = vpop.xlane.xlu0 %1941  ;;  %v1587_v29 = vsel %vm1523_vm3, %v3511_v25, 0.0 }
 0x8e4   :  { %2779 = vpow2.f32 %v1963_v26  ;;  %v1954_v30 = vsub.f32 %v3475_v2, %v1942_v7  ;;  %1588 = vadd.xlane.f32.xlu0 %v1587_v29  ;;  %v1939_v48 = vpop.xlane.xlu1 %1938  ;;  %v1584_v31 = vsel %vm1523_vm3, %v3513_v27, 0.0 }
 0x8e5   :  { %2781 = vpow2.f32 %v1961_v0  ;;  %v1953_v51 = vsub.f32 %v3477_v13, %v1939_v48  ;;  %1585 = vadd.xlane.f32.xlu1 %v1584_v31 }
 0x8e6   :  { %v3521_v40 = vpop.eup %2771  ;;  %v1967_v36 = vmul.f32 1.442695, %v1954_v30 }
 0x8e7   :  { %v3523_v58 = vpop.eup %2773  ;;  %v1965_v38 = vmul.f32 1.442695, %v1953_v51  ;;  %v1948_v17 = vpop.xlane.xlu0 %1947  ;;  %v1593_v6 = vsel %vm1523_vm3, %v3521_v40, 0.0 }
 0x8e8   :  { %2783 = vpow2.f32 %v1967_v36  ;;  %v1956_v2 = vsub.f32 %v3483_v60, %v1948_v17  ;;  %1594 = vadd.xlane.f32.xlu0 %v1593_v6  ;;  %v1945_v12 = vpop.xlane.xlu1 %1944  ;;  %v1590_v42 = vsel %vm1523_vm3, %v3523_v58, 0.0 }
 0x8e9   :  { %2785 = vpow2.f32 %v1965_v38  ;;  %v1955_v13 = vsub.f32 %v3485_v3, %v1945_v12  ;;  %1591 = vadd.xlane.f32.xlu1 %v1590_v42  ;;  %v2317_v12 = vld [vmem:[%s3692_s4 + $0x8] sm:$0xff] }
 0x8ea   :  { %v3531_v43 = vpop.eup %2775  ;;  %v1971_v46 = vmul.f32 1.442695, %v1956_v2 }
 0x8eb   :  { %v3533_v47 = vpop.eup %2777  ;;  %v1969_v49 = vmul.f32 1.442695, %v1955_v13  ;;  %v1976_v11 = vsel %vm1523_vm3, %v3531_v43, 0.0 }
 0x8ec   :  { %2787 = vpow2.f32 %v1971_v46  ;;  %1977 = vadd.xlane.f32.xlu0 %v1976_v11  ;;  %v1973_v60 = vsel %vm1523_vm3, %v3533_v47, 0.0 }
 0x8ed   :  { %2789 = vpow2.f32 %v1969_v49  ;;  %1974 = vadd.xlane.f32.xlu1 %v1973_v60 }
 0x8ee   :  { %v3539_v5 = vpop.eup %2779 }
 0x8ef   :  { %v3541_v3 = vpop.eup %2781  ;;  %v1982_v14 = vsel %vm1523_vm3, %v3539_v5, 0.0 }
 0x8f0   :  { %1983 = vadd.xlane.f32.xlu0 %v1982_v14  ;;  %v1979_v52 = vsel %vm1523_vm3, %v3541_v3, 0.0 }
 0x8f1   :  { %1980 = vadd.xlane.f32.xlu1 %v1979_v52 }
 0x8f2   :  { %v3547_v37 = vpop.eup %2783 }
 0x8f3   :  { %v3549_v28 = vpop.eup %2785  ;;  %v1988_v54 = vsel %vm1523_vm3, %v3547_v37, 0.0 }
 0x8f4   :  { %1989 = vadd.xlane.f32.xlu0 %v1988_v54  ;;  %v1985_v59 = vsel %vm1523_vm3, %v3549_v28, 0.0 }
 0x8f5   :  { %1986 = vadd.xlane.f32.xlu1 %v1985_v59 }
 0x8f6   :  { %v3555_v45 = vpop.eup %2787 }
 0x8f7   :  { %v3557_v35 = vpop.eup %2789  ;;  %v1994_v62 = vsel %vm1523_vm3, %v3555_v45, 0.0 }
 0x8f8   :  { %1995 = vadd.xlane.f32.xlu0 %v1994_v62  ;;  %v1991_v9 = vsel %vm1523_vm3, %v3557_v35, 0.0 }
 0x8f9   :  { %1992 = vadd.xlane.f32.xlu1 %v1991_v9 }
 0x969   :  { %v1577_v15 = vpop.xlane.xlu0 %1576 }
 0x96a   :  { %2791 = vrcp.f32 %v1577_v15  ;;  %v1574_v21 = vpop.xlane.xlu1 %1573 }
 0x96b   :  { %2793 = vrcp.f32 %v1574_v21 }
 0x96d   :  { %v1583_v55 = vpop.xlane.xlu0 %1582 }
 0x96e   :  { %2795 = vrcp.f32 %v1583_v55  ;;  %v1580_v32 = vpop.xlane.xlu1 %1579 }
 0x96f   :  { %2797 = vrcp.f32 %v1580_v32 }
 0x971   :  { %v1589_v34 = vpop.xlane.xlu0 %1588 }
 0x972   :  { %2799 = vrcp.f32 %v1589_v34  ;;  %v1586_v39 = vpop.xlane.xlu1 %1585 }
 0x973   :  { %2801 = vrcp.f32 %v1586_v39 }
 0x974   :  { %v2792_v56 = vpop.eup %2791 }
 0x975   :  { %v2794_v41 = vpop.eup %2793  ;;  %v1605_v50 = vmul.f32 %v2792_v56, %v3491_v10  ;;  %v1595_v16 = vpop.xlane.xlu0 %1594 }
 0x976   :  { %2803 = vrcp.f32 %v1595_v16  ;;  %v1592_v61 = vpop.xlane.xlu1 %1591  ;;  %v1604_v63 = vmul.f32 %v2794_v41, %v3493_v18 }
 0x977   :  { %v1613_v4 = vmul.f32 %v1605_v50, %v1379_v1  ;;  %2805 = vrcp.f32 %v1592_v61 }
 0x978   :  { %v2796_v33 = vpop.eup %2795  ;;  %v1612_v19 = vmul.f32 %v1604_v63, %v1379_v1 }
 0x979   :  { %v2798_v20 = vpop.eup %2797  ;;  %1773 = vst.msk [vmem:[#allocation2 + $0x8] sm:$0xff] %vm1523_vm3, %v1613_v4  ;;  %v1978_v57 = vpop.xlane.xlu0 %1977  ;;  %v1607_v23 = vmul.f32 %v2796_v33, %v3501_v44 }
 0x97a   :  { %2807 = vrcp.f32 %v1978_v57  ;;  %2580 = vmatprep.mubr.msk.f32.mxu0 %vm1523_vm3, %v1612_v19  ;;  %1772 = vst.msk [vmem:[#allocation2] sm:$0xff] %vm1523_vm3, %v1612_v19  ;;  %v1975_v10 = vpop.xlane.xlu1 %1974  ;;  %v1606_v24 = vmul.f32 %v2798_v20, %v3503_v22  ;;  %v2834_v19 = vld [vmem:[%s3693_s5 + $0x10] sm:$0xff] }
 0x97b   :  { %2809 = vrcp.f32 %v1975_v10  ;;  %2581 = vmatmul.mubr.msk.f32.vlgmr.msra.gmra.mrb[22].mxu0 %vm1523_vm3, %v1613_v4  ;;  %v1615_v18 = vmul.f32 %v1607_v23, %v1379_v1  ;;  %v2833_v4 = vld [vmem:[%s3693_s5 + $0x18] sm:$0xff] }
 0x97c   :  { %v2800_v26 = vpop.eup %2799  ;;  %2683 = vmatpush3.bf16.msra.mxu0 %v2680_v8  ;;  %v1614_v0 = vmul.f32 %v1606_v24, %v1379_v1 }
 0x97d   :  { %v2802_v7 = vpop.eup %2801  ;;  %v1984_v29 = vpop.xlane.xlu0 %1983  ;;  %1775 = vst.msk [vmem:[#allocation2 + $0x18] sm:$0xff] %vm1523_vm3, %v1615_v18  ;;  %v1609_v44 = vmul.f32 %v2800_v26, %v3511_v25  ;;  %v2835_v26 = vld [vmem:[%s3693_s5 + $0x28] sm:$0xff] }
 0x97e   :  { %2811 = vrcp.f32 %v1984_v29  ;;  %2583 = vmatprep.mubr.msk.f32.mxu0 %vm1523_vm3, %v1614_v0  ;;  %1774 = vst.msk [vmem:[#allocation2 + $0x10] sm:$0xff] %vm1523_vm3, %v1614_v0  ;;  %v1981_v30 = vpop.xlane.xlu1 %1980  ;;  %v1608_v22 = vmul.f32 %v2802_v7, %v3513_v27  ;;  %v2836_v7 = vld [vmem:[%s3693_s5 + $0x20] sm:$0xff] }
 0x97f   :  { %2813 = vrcp.f32 %v1981_v30  ;;  %2584 = vmatmul.mubr.msk.f32.gmra.mrb[24].mxu0 %vm1523_vm3, %v1615_v18  ;;  %v1617_v48 = vmul.f32 %v1609_v44, %v1379_v1 }
 0x980   :  { %v2804_v31 = vpop.eup %2803  ;;  %v1616_v51 = vmul.f32 %v1608_v22, %v1379_v1 }
 0x981   :  { %v2806_v36 = vpop.eup %2805  ;;  %v1990_v38 = vpop.xlane.xlu0 %1989  ;;  %1777 = vst.msk [vmem:[#allocation2 + $0x28] sm:$0xff] %vm1523_vm3, %v1617_v48  ;;  %v1611_v25 = vmul.f32 %v2804_v31, %v3521_v40 }
 0x982   :  { %2815 = vrcp.f32 %v1990_v38  ;;  %2586 = vmatprep.mubr.msk.f32.mxu0 %vm1523_vm3, %v1616_v51  ;;  %1776 = vst.msk [vmem:[#allocation2 + $0x20] sm:$0xff] %vm1523_vm3, %v1616_v51  ;;  %v1987_v17 = vpop.xlane.xlu1 %1986  ;;  %v1610_v27 = vmul.f32 %v2806_v36, %v3523_v58  ;;  %v2837_v36 = vld [vmem:[%s3693_s5 + $0x38] sm:$0xff] }
 0x983   :  { %2817 = vrcp.f32 %v1987_v17  ;;  %2587 = vmatmul.mubr.msk.f32.gmra.mrb[26].mxu0 %vm1523_vm3, %v1617_v48  ;;  %v1619_v6 = vmul.f32 %v1611_v25, %v1379_v1  ;;  %v2838_v25 = vld [vmem:[%s3693_s5 + $0x30] sm:$0xff] }
 0x984   :  { %v2808_v2 = vpop.eup %2807  ;;  %v1618_v42 = vmul.f32 %v1610_v27, %v1379_v1 }
 0x985   :  { %v2810_v13 = vpop.eup %2809  ;;  %v2006_v40 = vmul.f32 %v2808_v2, %v3531_v43  ;;  %v1996_v46 = vpop.xlane.xlu0 %1995  ;;  %1779 = vst.msk [vmem:[#allocation2 + $0x38] sm:$0xff] %vm1523_vm3, %v1619_v6 }
 0x986   :  { %2819 = vrcp.f32 %v1996_v46  ;;  %2589 = vmatprep.mubr.msk.f32.mxu0 %vm1523_vm3, %v1618_v42  ;;  %1778 = vst.msk [vmem:[#allocation2 + $0x30] sm:$0xff] %vm1523_vm3, %v1618_v42  ;;  %v1993_v58 = vpop.xlane.xlu1 %1992  ;;  %v2005_v49 = vmul.f32 %v2810_v13, %v3533_v47 }
 0x987   :  { %v2014_v11 = vmul.f32 %v2317_v12, %v2006_v40  ;;  %2821 = vrcp.f32 %v1993_v58  ;;  %2590 = vmatmul.mubr.msk.f32.gmra.mrb[28].mxu0 %vm1523_vm3, %v1619_v6 }
 0x988   :  { %v2812_v60 = vpop.eup %2811  ;;  %v2013_v14 = vmul.f32 %v2317_v12, %v2005_v49 }
 0x989   :  { %v2814_v52 = vpop.eup %2813  ;;  %2175 = vst.msk [vmem:[#allocation2 + $0x48] sm:$0xff] %vm1523_vm3, %v2014_v11  ;;  %v2008_v43 = vmul.f32 %v2812_v60, %v3539_v5 }
 0x98a   :  { %2612 = vmatprep.mubr.msk.f32.mxu0 %vm1523_vm3, %v2013_v14  ;;  %2174 = vst.msk [vmem:[#allocation2 + $0x40] sm:$0xff] %vm1523_vm3, %v2013_v14  ;;  %v2007_v54 = vmul.f32 %v2814_v52, %v3541_v3 }
 0x98b   :  { %2613 = vmatmul.mubr.msk.f32.vlgmr.msra.gmra.mrb[30].mxu0 %vm1523_vm3, %v2014_v11  ;;  %v2016_v47 = vmul.f32 %v2317_v12, %v2008_v43 }
 0x98c   :  { %v2816_v59 = vpop.eup %2815  ;;  %v2015_v62 = vmul.f32 %v2317_v12, %v2007_v54 }
 0x98d   :  { %v2818_v9 = vpop.eup %2817  ;;  %2177 = vst.msk [vmem:[#allocation2 + $0x58] sm:$0xff] %vm1523_vm3, %v2016_v47  ;;  %v2010_v53 = vmul.f32 %v2816_v59, %v3547_v37 }
 0x98e   :  { %2615 = vmatprep.mubr.msk.f32.mxu0 %vm1523_vm3, %v2015_v62  ;;  %2176 = vst.msk [vmem:[#allocation2 + $0x50] sm:$0xff] %vm1523_vm3, %v2015_v62  ;;  %v2009_v5 = vmul.f32 %v2818_v9, %v3549_v28 }
 0x98f   :  { %2616 = vmatmul.mubr.msk.f32.gmra.mrb[32].mxu0 %vm1523_vm3, %v2016_v47  ;;  %v2018_v8 = vmul.f32 %v2317_v12, %v2010_v53 }
 0x990   :  { %v2820_v3 = vpop.eup %2819  ;;  %v2017_v15 = vmul.f32 %v2317_v12, %v2009_v5 }
 0x991   :  { %v2822_v21 = vpop.eup %2821  ;;  %2179 = vst.msk [vmem:[#allocation2 + $0x68] sm:$0xff] %vm1523_vm3, %v2018_v8  ;;  %v2012_v55 = vmul.f32 %v2820_v3, %v3555_v45  ;;  %v2831_v45 = vld [vmem:[%s3693_s5 + $0x8] sm:$0xff] }
 0x992   :  { %2618 = vmatprep.mubr.msk.f32.mxu0 %vm1523_vm3, %v2017_v15  ;;  %2178 = vst.msk [vmem:[#allocation2 + $0x60] sm:$0xff] %vm1523_vm3, %v2017_v15  ;;  %v2011_v37 = vmul.f32 %v2822_v21, %v3557_v35  ;;  %v2832_v35 = vld [vmem:[%s3693_s5] sm:$0xff]  ;;  %s2864_s5 = smov [#allocation2]  }
 0x993   :  { %2619 = vmatmul.mubr.msk.f32.gmra.mrb[34].mxu0 %vm1523_vm3, %v2018_v8  ;;  %v2020_v32 = vmul.f32 %v2317_v12, %v2012_v55  ;;  %s2233_s26 = sshll.u32 %s2864_s5, 4  ;;  %s2234_s26 = int_to_ptr.vmem [resolvable:$true] %s2233_s26 }
 0x994   :  { %v2019_v28 = vmul.f32 %v2317_v12, %v2011_v37  ;;  %s2839_s28 = scalar_lea.vmem %s2234_s26, 2048  ;;  %p2844_p1 = scmp.lt.s32.totalorder %s2234_s26, %s2234_s26 }
 0x995   :  { %2181 = vst.msk [vmem:[#allocation2 + $0x78] sm:$0xff] %vm1523_vm3, %v2020_v32  ;;  %p2840_p0 = scmp.ne.s32.totalorder %s2234_s26, %s2839_s28  ;;  %p2845_p2 = scmp.lt.s32.totalorder %s2839_s28, %s2839_s28 }
 0x996   :  { %2621 = vmatprep.mubr.msk.f32.mxu0 %vm1523_vm3, %v2019_v28  ;;  %2180 = vst.msk [vmem:[#allocation2 + $0x70] sm:$0xff] %vm1523_vm3, %v2019_v28 }
 0x997   :  { %2622 = vmatmul.mubr.msk.f32.gmra.mrb[36].mxu0 %vm1523_vm3, %v2020_v32  ;;  %p2846_p3 = por %p2845_p2, %p2844_p1 }
 0x999   :  { %p2847_p4 = pnand %p2846_p3, %p2840_p0 }
 0xa4e   :  { %v2582_v34 = vpop.f32.mrb[22].mxu0 }
 0xa4f   :  { %v1750_v39 = vmul.f32 %v2831_v45, %v2582_v34  ;;  %v1710_v56 = vpop.f32.mrb[23].mxu0 }
 0xa50   :  { %v1749_v1 = vmul.f32 %v2832_v35, %v1710_v56 }
 0xa51   :  { %v1758_v41 = vsel %vm87_vm0, %v1750_v39, 0.0 }
 0xa52   :  { %v1757_v50 = vsel %vm87_vm0, %v1749_v1, 0.0  ;;  %v2585_v16 = vpop.f32.mrb[24].mxu0 }
 0xa53   :  { %v1759_v61 = vadd.f32 %v1758_v41, %v1757_v50  ;;  %v1720_v63 = vpop.f32.mrb[25].mxu0  ;;  %v1752_v33 = vmul.f32 %v2833_v4, %v2585_v16 }
 0xa54   :  { %v1751_v20 = vmul.f32 %v2834_v19, %v1720_v63 }
 0xa55   :  { %v1762_v18 = vsel %vm87_vm0, %v1752_v33, 0.0 }
 0xa56   :  { %v1760_v57 = vsel %vm87_vm0, %v1751_v20, 0.0  ;;  %v2588_v23 = vpop.f32.mrb[26].mxu0 }
 0xa57   :  { %v1761_v10 = vadd.f32 %v1760_v57, %v1759_v61  ;;  %v1730_v24 = vpop.f32.mrb[27].mxu0  ;;  %v1754_v0 = vmul.f32 %v2835_v26, %v2588_v23 }
 0xa58   :  { %v1753_v29 = vmul.f32 %v2836_v7, %v1730_v24 }
 0xa59   :  { %v1763_v44 = vadd.f32 %v1762_v18, %v1761_v10  ;;  %v1766_v51 = vsel %vm87_vm0, %v1754_v0, 0.0 }
 0xa5a   :  { %v1764_v30 = vsel %vm87_vm0, %v1753_v29, 0.0  ;;  %v2591_v22 = vpop.f32.mrb[28].mxu0 }
 0xa5b   :  { %v1765_v48 = vadd.f32 %v1764_v30, %v1763_v44  ;;  %v1740_v31 = vpop.f32.mrb[29].mxu0  ;;  %v1756_v38 = vmul.f32 %v2837_v36, %v2591_v22 }
 0xa5c   :  { %v1755_v17 = vmul.f32 %v2838_v25, %v1740_v31 }
 0xa5d   :  { %v1767_v27 = vadd.f32 %v1766_v51, %v1765_v48  ;;  %v1770_v40 = vsel %vm87_vm0, %v1756_v38, 0.0 }
 0xa5e   :  { %v1768_v6 = vsel %vm87_vm0, %v1755_v17, 0.0  ;;  %v2614_v2 = vpop.f32.mrb[30].mxu0 }
 0xa5f   :  { %v1769_v12 = vadd.f32 %v1768_v6, %v1767_v27  ;;  %v2151_v42 = vmul.f32 %v2831_v45, %v2614_v2  ;;  %v2111_v13 = vpop.f32.mrb[31].mxu0 }
 0xa60   :  { %v2150_v46 = vmul.f32 %v2832_v35, %v2111_v13 }
 0xa61   :  { %v2159_v58 = vsel %vm87_vm0, %v2151_v42, 0.0  ;;  %v3654_v49 = vadd.f32 %v1770_v40, %v1769_v12 }
 0xa62   :  { %v2158_v11 = vsel %vm87_vm0, %v2150_v46, 0.0  ;;  %v2617_v60 = vpop.f32.mrb[32].mxu0 }
 0xa63   :  { %v2160_v14 = vadd.f32 %v2159_v58, %v2158_v11  ;;  %v2121_v52 = vpop.f32.mrb[33].mxu0  ;;  %v2182_v43 = vmul.f32 %v3654_v49, %v3654_v49  ;;  %v2153_v54 = vmul.f32 %v2833_v4, %v2617_v60 }
 0xa64   :  { %v2152_v47 = vmul.f32 %v2834_v19, %v2121_v52 }
 0xa65   :  { %v2184_v59 = vsel %vm87_vm0, %v2182_v43, 0.0  ;;  %v2163_v8 = vsel %vm87_vm0, %v2153_v54, 0.0 }
 0xa66   :  { %v2161_v62 = vsel %vm87_vm0, %v2152_v47, 0.0  ;;  %2185 = vadd.xlane.f32.xlu1 %v2184_v59  ;;  %v2620_v9 = vpop.f32.mrb[34].mxu0 }
 0xa67   :  { %v2162_v53 = vadd.f32 %v2161_v62, %v2160_v14  ;;  %v2131_v5 = vpop.f32.mrb[35].mxu0  ;;  %v2155_v3 = vmul.f32 %v2835_v26, %v2620_v9 }
 0xa68   :  { %v2154_v15 = vmul.f32 %v2836_v7, %v2131_v5 }
 0xa69   :  { %v2164_v21 = vadd.f32 %v2163_v8, %v2162_v53  ;;  %v2167_v34 = vsel %vm87_vm0, %v2155_v3, 0.0 }
 0xa6a   :  { %v2165_v55 = vsel %vm87_vm0, %v2154_v15, 0.0  ;;  %v2623_v37 = vpop.f32.mrb[36].mxu0 }
 0xa6b   :  { %v2166_v32 = vadd.f32 %v2165_v55, %v2164_v21  ;;  %v2141_v28 = vpop.f32.mrb[37].mxu0  ;;  %v2157_v45 = vmul.f32 %v2837_v36, %v2623_v37 }
 0xa6c   :  { %v2156_v39 = vmul.f32 %v2838_v25, %v2141_v28 }
 0xa6d   :  { %v2168_v56 = vadd.f32 %v2167_v34, %v2166_v32  ;;  %v2171_v41 = vsel %vm87_vm0, %v2157_v45, 0.0 }
 0xa6e   :  { %v2169_v35 = vsel %vm87_vm0, %v2156_v39, 0.0 }
 0xa6f   :  { %v2170_v1 = vadd.f32 %v2169_v35, %v2168_v56 }
 0xa71   :  { %v2172_v50 = vadd.f32 %v2171_v41, %v2170_v1 }
 0xa73   :  { %v2183_v16 = vmul.f32 %v2172_v50, %v2172_v50 }
 0xa75   :  { %v2187_v61 = vsel %vm87_vm0, %v2183_v16, 0.0 }
 0xa76   :  { %2188 = vadd.xlane.f32.xlu0 %v2187_v61 }
 0xa77   :  { %2850 = shalt.err (!%p2847_p4)
}
 0xa78   :  { %s2851_s12 = scalar_lea.hbm %s3707_s19, 2048 }
 0xa79   :  { %p2852_p5 = scmp.ne.s32.totalorder %s3707_s19, %s2851_s12  ;;  %p2855_p6 = scmp.lt.u32.totalorder %s2851_s12, %s3707_s19 }
 0xa7b   :  { %p2857_p7 = pnand %p2855_p6, %p2852_p5 }
 0xa7d   :  { %2860 = shalt.err (!%p2857_p7)
}
 0xa7e   :  { %s2865_s7 = smov 128   ;;  %s2866_s6 = smov 8   ;;  %v2867_v7 = vmov 0.0  }
 0xa7f   :  { %2239 = dma.vmem_to_hbm [thread:$0]  %s2234_s26, 2048, %s3707_s19, [#allocation3], %s2865_s7, %s2865_s7, %s2866_s6  }
 0xaf3   :  { %v2186_v63 = vpop.xlane.xlu1 %2185 }
 0xaf4   :  { %2823 = vrsqrt.f32 %v2186_v63  ;;  %vm2192_vm4 = vcmp.eq.f32.partialorder %v2186_v63, inf  ;;  %v2195_v57 = vand.u32 2147483648, %v2186_v63  ;;  %vm2194_vm5 = vcmp.eq.f32.partialorder %v2186_v63, 0.0 }
 0xafe   :  { %v2824_v33 = vpop.eup %2823 }
 0xaff   :  { %v2191_v19 = vmul.f32 %v2824_v33, %v2186_v63 }
 0xb01   :  { %v2193_v20 = vsel %vm2192_vm4, %v2186_v63, %v2191_v19 }
 0xb02   :  { %v2196_v10 = vsel %vm2194_vm5, %v2195_v57, %v2193_v20 }
 0xb03   :  { %v2189_v4 = vpop.xlane.xlu0 %2188  ;;  %vm2204_vm7 = vcmp.eq.f32.partialorder %v2196_v10, 0.0 }
 0xb04   :  { %2825 = vrsqrt.f32 %v2189_v4  ;;  %vm2199_vm6 = vcmp.eq.f32.partialorder %v2189_v4, inf  ;;  %v2202_v18 = vand.u32 2147483648, %v2189_v4  ;;  %vm2201_vm8 = vcmp.eq.f32.partialorder %v2189_v4, 0.0 }
 0xb05   :  { %v2336_v29 = vsel %vm2204_vm7, 1.0, %v2867_v7 }
 0xb0e   :  { %v2826_v23 = vpop.eup %2825 }
 0xb0f   :  { %v2198_v24 = vmul.f32 %v2826_v23, %v2189_v4 }
 0xb11   :  { %v2200_v26 = vsel %vm2199_vm6, %v2189_v4, %v2198_v24 }
 0xb12   :  { %v2203_v0 = vsel %vm2201_vm8, %v2202_v18, %v2200_v26 }
 0xb13   :  { %vm2205_vm9 = vcmp.eq.f32.partialorder %v2203_v0, 0.0 }
 0xb14   :  { %v2337_v44 = vsel %vm2205_vm9, 1.0, %v2867_v7 }
 0xb15   :  { %v2210_v30 = vmax.f32 %v2336_v29, %v2337_v44 }
 0xb17   :  { %v2211_v22 = vrot.slane %v2210_v30, 4 }
 0xb19   :  { %v2212_v48 = vmax.f32 %v2210_v30, %v2211_v22 }
 0xb1b   :  { %v2213_v31 = vrot.slane %v2212_v48, 2 }
 0xb1d   :  { %v2214_v51 = vmax.f32 %v2212_v48, %v2213_v31 }
 0xb1f   :  { %v2215_v36 = vrot.slane %v2214_v51, 1 }
 0xb21   :  { %v2216_v38 = vmax.f32 %v2214_v51, %v2215_v36 }
 0xb23   :  { %v2217_v25 = vmul.f32 1e-10, %v2216_v38 }
 0xb25   :  { %v2218_v17 = vadd.f32 %v2217_v25, %v2196_v10  ;;  %v2219_v27 = vadd.f32 %v2217_v25, %v2203_v0 }
 0xb27   :  { %2827 = vrcp.f32 %v2218_v17 }
 0xb28   :  { %2829 = vrcp.f32 %v2219_v27 }
 0xb31   :  { %v2828_v6 = vpop.eup %2827 }
 0xb32   :  { %v2830_v2 = vpop.eup %2829  ;;  %v2221_v12 = vmul.f32 %v2828_v6, %v3654_v49 }
 0xb33   :  { %v2223_v42 = vmul.f32 %v2830_v2, %v2172_v50 }
 0xb34   :  { %2224 = vst.msk [vmem:[%s3706_s18] sm:$0xff] %vm87_vm0, %v2221_v12 }
 0xb35   :  { %2225 = vst.msk [vmem:[%s3706_s18 + $0x8] sm:$0xff] %vm87_vm0, %v2223_v42 }
 0xb36   :  { %2861 = dma.done.wait [#allocation3], 2048  }
 0xb37   :  { %2862 = vsyncadd [#allocation3], 4294965248 }
 0xb38   :  { %2245 = vsyncpa [#allocation3], 1 }

</bundles_post_ra>
